<compile_context>
chip_gen: v5e
topology: v5e:2x2
jax: 0.10.0
libtpu: 0.0.40
codegen_flags: <defaults>
</compile_context>

<pallas_src>
import jax
import jax.numpy as jnp
from jax.experimental import pallas as pl
from jax.experimental.pallas import tpu as pltpu

LANE = 128


def _round_up(x, m):
    return ((x + m - 1) // m) * m


def _softplus(x):
    # Numerically stable softplus; matches torch softplus(beta=1, threshold=20)
    # within f32 eps (for x > 20 the log1p term vanishes relative to x).
    return jnp.maximum(x, 0.0) + jnp.log1p(jnp.exp(-jnp.abs(x)))


def _mm(a, b):
    # MXU matmul with f32 accumulation; the activation operand is cast to the
    # weight/operand storage dtype (f32 or bf16).
    return jnp.dot(a.astype(b.dtype), b, preferred_element_type=jnp.float32)


def _critic_kernel(state_ref, action_ref, kt_ref, v_ref,
                   wq_ref, bq_ref, w1_ref, b1_ref,
                   w2_ref, b2_ref, w3_ref, b3_ref,
                   wo_ref, bo_ref, out_ref):
    cd = wq_ref.dtype               # matmul operand storage dtype (f32 / bf16)

    x = state_ref[...]              # (TQ, OP) f32 query rows for this tile
    a = action_ref[...]             # (TQ, AP) f32

    # --- SelfAttention(obs) over the batch dimension -----------------------
    # Q projection (softmax 1/sqrt(obs) scale pre-folded into wq/bq).
    q = _mm(x, wq_ref[...]) + bq_ref[...]                 # (TQ, OP) f32

    # Scores against the precomputed, pre-transposed keys (OP, B): a plain
    # MXU matmul, no in-kernel transpose.
    scores = _mm(q, kt_ref[...])                          # (TQ, B) f32
    scores = scores - jnp.max(scores, axis=-1, keepdims=True)
    e = jnp.exp(scores)
    attn = e / jnp.sum(e, axis=-1, keepdims=True)         # exact divide
    attended = _mm(attn, v_ref[...])                      # (TQ, OP) f32

    # --- fc1 as a single fused K = OP + AP contraction ---------------------
    # attended and action are both lane-dense 128-wide slabs; concatenating
    # along lanes gives one (TQ, OP+AP) activation and a single 256-deep
    # matmul (fills the 2x256^2 MXU on v6e/v7x).
    xcat = jnp.concatenate([attended.astype(cd), a.astype(cd)], axis=1)
    h = _softplus(_mm(xcat, w1_ref[...]) + b1_ref[...])
    h = _softplus(_mm(h, w2_ref[...]) + b2_ref[...])
    h = _softplus(_mm(h, w3_ref[...]) + b3_ref[...])
    out_ref[...] = _mm(h, wo_ref[...]) + bo_ref[...]      # (TQ, 128); q in lane 0


def _pad2(w, rows, cols):
    out = jnp.zeros((rows, cols), jnp.float32)
    return out.at[:w.shape[0], :w.shape[1]].set(w.astype(jnp.float32))


def prepare_kernel_params(params, obs_size, act_size, hidden_size,
                          compute_dtype=jnp.bfloat16):
    """Pad to lane-dense widths, fuse fc1, fold the softmax scale into Q."""
    OP = _round_up(obs_size, LANE)
    AP = _round_up(act_size, LANE)
    HP = _round_up(hidden_size, LANE)
    QP = LANE  # padded output lanes (real q value lives in lane 0)

    scale = 1.0 / (obs_size ** 0.5)

    # fc1 fused weight: rows [0, OP) hold the (padded) state part, rows
    # [OP, OP+AP) hold the (padded) action part -> one K=OP+AP matmul.
    w1 = jnp.zeros((OP + AP, HP), jnp.float32)
    w1 = w1.at[:obs_size, :hidden_size].set(params["w1s_t"].astype(jnp.float32))
    w1 = w1.at[OP:OP + act_size, :hidden_size].set(
        params["w1a_t"].astype(jnp.float32))

    kp = {
        # attention (wk/wv/bk/bv stay f32 — only used once, in the wrapper)
        "wq": _pad2(params["wq_t"] * scale, OP, OP).astype(compute_dtype),
        "bq": _pad2(params["bq"] * scale, 1, OP),
        "wk": _pad2(params["wk_t"], OP, OP),
        "bk": _pad2(params["bk"], 1, OP),
        "wv": _pad2(params["wv_t"], OP, OP),
        "bv": _pad2(params["bv"], 1, OP),
        # MLP
        "w1": w1.astype(compute_dtype),
        "b1": _pad2(params["b1"], 1, HP),
        "w2": _pad2(params["w2_t"], HP, HP).astype(compute_dtype),
        "b2": _pad2(params["b2"], 1, HP),
        "w3": _pad2(params["w3_t"], HP, HP).astype(compute_dtype),
        "b3": _pad2(params["b3"], 1, HP),
        "wo": _pad2(params["wo_t"], HP, QP).astype(compute_dtype),
        "bo": _pad2(params["bo"], 1, QP),
    }
    return kp, (OP, AP, HP, QP)


def _pick_tile(b):
    # Largest divisor of B from the list (prefer 256: MXU M granularity on
    # v6e/v7x), but capped so the per-tile (tq, B) f32 scores block stays a
    # few MiB to avoid flipping into a spill-bound regime at large B.
    budget = 4 * 2 ** 20
    chosen = None
    for t in (8, 16, 32, 64, 128, 256):
        if b % t == 0 and (chosen is None or t * b * 4 <= budget):
            chosen = t
    return chosen if chosen is not None else b


def critic_forward(state, action, params, compute_dtype=jnp.bfloat16, tq=None):
    """state: (B, obs) f32, action: (B, act) f32 -> (B, 1) f32."""
    B, obs_size = state.shape
    _, act_size = action.shape
    hidden_size = params["w2_t"].shape[0]

    kp, (OP, AP, HP, QP) = prepare_kernel_params(
        params, obs_size, act_size, hidden_size, compute_dtype)

    state_p = jnp.zeros((B, OP), jnp.float32).at[:, :obs_size].set(state)
    action_p = jnp.zeros((B, AP), jnp.float32).at[:, :act_size].set(action)

    # ---- K/V hoisted out of the kernel: computed ONCE here ----------------
    # Attention mixes batch rows, so K/V need every row; recomputing them per
    # query tile inside the kernel was redundant MXU work. K is stored
    # pre-transposed so the in-kernel scores matmul needs no transpose.
    k = state_p @ kp["wk"] + kp["bk"]                       # (B, OP) f32
    v = (state_p @ kp["wv"] + kp["bv"]).astype(compute_dtype)   # (B, OP)
    kt = k.T.astype(compute_dtype)                          # (OP, B)

    if tq is None:
        tq = _pick_tile(B)
    assert B % tq == 0, "query-row tile must divide the batch"
    grid = (B // tq,)

    weight_names = ("wq", "bq", "w1", "b1", "w2", "b2", "w3", "b3", "wo", "bo")
    weights = [kp[n] for n in weight_names]
    residents = [kt, v] + weights

    tile_row = lambda i: (i, 0)
    resident_map = lambda i: (0, 0)

    # Advisory cost estimate so XLA can overlap this call with its neighbors.
    flops = 2 * B * (OP * OP + 2 * OP * B + (OP + AP) * HP
                     + 2 * HP * HP + HP * QP)
    transcendentals = B * (B + 6 * HP)
    bytes_accessed = (sum(int(a.size) * a.dtype.itemsize for a in residents)
                      + (int(state_p.size) + int(action_p.size) + B * QP) * 4)
    cost = pl.CostEstimate(flops=int(flops),
                           transcendentals=int(transcendentals),
                           bytes_accessed=int(bytes_accessed))

    # Explicit scoped-VMEM limit: residents + (double-buffered) tiles +
    # headroom for the (tq, B) scores; never below the 32 MiB default, never
    # above what v7x can give.
    resident_bytes = sum(int(a.size) * a.dtype.itemsize for a in residents)
    tile_bytes = 2 * 4 * tq * (OP + AP + QP) + 4 * tq * max(B, LANE) * 4
    vmem_limit = int(min(max(2 * resident_bytes + tile_bytes, 32 * 2 ** 20),
                         100 * 2 ** 20))

    def run(single_buffer_resident):
        if single_buffer_resident:
            def res_spec(arr):
                # Resident blocks never change block index -> one buffer is
                # enough; halves resident VMEM (matters most on v7x).
                return pl.BlockSpec(arr.shape, resident_map,
                                    pipeline_mode=pl.Buffered(1))
        else:
            def res_spec(arr):
                return pl.BlockSpec(arr.shape, resident_map)

        in_specs = ([pl.BlockSpec((tq, OP), tile_row),   # query-row state tile
                     pl.BlockSpec((tq, AP), tile_row)]   # action tile
                    + [res_spec(arr) for arr in residents])

        return pl.pallas_call(
            _critic_kernel,
            out_shape=jax.ShapeDtypeStruct((B, QP), jnp.float32),
            grid=grid,
            in_specs=in_specs,
            out_specs=pl.BlockSpec((tq, QP), tile_row),
            compiler_params=pltpu.CompilerParams(
                # "parallel" lets megacore chips shard query tiles across
                # TensorCores.
                # TODO(synk): on v7x, use pltpu.CORE_PARALLEL / core_map to
                # guarantee the 2-TensorCore split of the tile axis.
                dimension_semantics=("parallel",),
                vmem_limit_bytes=vmem_limit),
            cost_estimate=cost,
        )(state_p, action_p, *residents)

    try:
        out_padded = run(True)
    except Exception:
        # Installed jax may reject Buffered(1); fall back to default buffering.
        out_padded = run(False)

    return out_padded[:, :1]


def make_params(key, obs_size, act_size, hidden_size):
    """Deterministic Xavier-uniform weights, zero biases (as initialize_weights)."""
    def xavier(key, fan_in, fan_out):
        bound = (6.0 / (fan_in + fan_out)) ** 0.5
        # stored pre-transposed as (in, out)
        return jax.random.uniform(key, (fan_in, fan_out), jnp.float32,
                                  -bound, bound)

    ks = jax.random.split(key, 7)
    H = hidden_size
    params = {
        # SelfAttention(obs_size): Linear(obs, obs) x 3
        "wq_t": xavier(ks[0], obs_size, obs_size),
        "bq": jnp.zeros((1, obs_size), jnp.float32),
        "wk_t": xavier(ks[1], obs_size, obs_size),
        "bk": jnp.zeros((1, obs_size), jnp.float32),
        "wv_t": xavier(ks[2], obs_size, obs_size),
        "bv": jnp.zeros((1, obs_size), jnp.float32),
        # fc1: Linear(obs+act, H); stored split into state / action parts.
        "b1": jnp.zeros((1, H), jnp.float32),
        "w2_t": xavier(ks[4], H, H),
        "b2": jnp.zeros((1, H), jnp.float32),
        "w3_t": xavier(ks[5], H, H),
        "b3": jnp.zeros((1, H), jnp.float32),
        "wo_t": xavier(ks[6], H, 1),
        "bo": jnp.zeros((1, 1), jnp.float32),
    }
    w1_t = xavier(ks[3], obs_size + act_size, H)   # full (obs+act, H) fc1^T
    params["w1s_t"] = w1_t[:obs_size, :]
    params["w1a_t"] = w1_t[obs_size:, :]
    return params


def _reference_forward(state, action, params, obs_size):
    """Plain-JAX reference reproducing the PyTorch forward."""
    q = state @ params["wq_t"] + params["bq"]
    k = state @ params["wk_t"] + params["bk"]
    v = state @ params["wv_t"] + params["bv"]
    scores = (q @ k.T) / (obs_size ** 0.5)
    attn = jax.nn.softmax(scores, axis=-1)
    attended = attn @ v
    x = jnp.concatenate([attended, action], axis=1)
    w1_t = jnp.concatenate([params["w1s_t"], params["w1a_t"]], axis=0)
    x = jax.nn.softplus(x @ w1_t + params["b1"])
    x = jax.nn.softplus(x @ params["w2_t"] + params["b2"])
    x = jax.nn.softplus(x @ params["w3_t"] + params["b3"])
    return x @ params["wo_t"] + params["bo"]


if __name__ == "__main__":
    B, obs_size, act_size, hidden_size = 8, 16, 8, 32

    key = jax.random.PRNGKey(0)
    k_state, k_action, k_params = jax.random.split(key, 3)
    state = jax.random.normal(k_state, (B, obs_size), jnp.float32)
    action = jax.random.normal(k_action, (B, act_size), jnp.float32)
    params = make_params(k_params, obs_size, act_size, hidden_size)

    q_ref = _reference_forward(state, action, params, obs_size)

    # Exact-precision run (f32 matmul operands) -> tight check vs. reference.
    q_f32 = critic_forward(state, action, params, compute_dtype=jnp.float32)
    jax.block_until_ready(q_f32)
    assert q_f32.shape == (B, 1)
    assert jnp.allclose(q_f32, q_ref, atol=2e-3, rtol=2e-3), (
        float(jnp.max(jnp.abs(q_f32 - q_ref))))

    # Default path (bf16 matmul operands, f32 accumulation) -> loose check.
    q_bf16 = critic_forward(state, action, params)
    jax.block_until_ready(q_bf16)
    assert q_bf16.shape == (B, 1)
    assert jnp.allclose(q_bf16, q_ref, atol=1e-1, rtol=1e-1), (
        float(jnp.max(jnp.abs(q_bf16 - q_ref))))

    print("KERNEL_OK")
</pallas_src>

<mosaic_0001>
module attributes {stable_mosaic.version = 11 : i64} {
  func.func @_critic_kernel(%arg0: i32, %arg1: memref<8x128xf32, #tpu.memory_space<vmem>>, %arg2: memref<8x128xf32, #tpu.memory_space<vmem>>, %arg3: memref<128x8xf32, #tpu.memory_space<vmem>>, %arg4: memref<8x128xf32, #tpu.memory_space<vmem>>, %arg5: memref<128x128xf32, #tpu.memory_space<vmem>>, %arg6: memref<1x128xf32, #tpu.memory_space<vmem>>, %arg7: memref<256x128xf32, #tpu.memory_space<vmem>>, %arg8: memref<1x128xf32, #tpu.memory_space<vmem>>, %arg9: memref<128x128xf32, #tpu.memory_space<vmem>>, %arg10: memref<1x128xf32, #tpu.memory_space<vmem>>, %arg11: memref<128x128xf32, #tpu.memory_space<vmem>>, %arg12: memref<1x128xf32, #tpu.memory_space<vmem>>, %arg13: memref<128x128xf32, #tpu.memory_space<vmem>>, %arg14: memref<1x128xf32, #tpu.memory_space<vmem>>, %arg15: memref<8x128xf32, #tpu.memory_space<vmem>>) attributes {dimension_semantics = [#tpu.dimension_semantics<parallel>], iteration_bounds = array<i64: 1>, scalar_prefetch = 0 : i64, scratch_operands = 0 : i64, tpu.core_type = #tpu.core_type<tc>, window_params = [{transform_indices = @transform_0, window_bounds = array<i64: 8, 128>}, {transform_indices = @transform_1, window_bounds = array<i64: 8, 128>}, {pipeline_mode = #tpu.pipeline_mode<synchronous>, transform_indices = @transform_2, window_bounds = array<i64: 128, 8>}, {pipeline_mode = #tpu.pipeline_mode<synchronous>, transform_indices = @transform_3, window_bounds = array<i64: 8, 128>}, {pipeline_mode = #tpu.pipeline_mode<synchronous>, transform_indices = @transform_4, window_bounds = array<i64: 128, 128>}, {pipeline_mode = #tpu.pipeline_mode<synchronous>, transform_indices = @transform_5, window_bounds = array<i64: 1, 128>}, {pipeline_mode = #tpu.pipeline_mode<synchronous>, transform_indices = @transform_6, window_bounds = array<i64: 256, 128>}, {pipeline_mode = #tpu.pipeline_mode<synchronous>, transform_indices = @transform_7, window_bounds = array<i64: 1, 128>}, {pipeline_mode = #tpu.pipeline_mode<synchronous>, transform_indices = @transform_8, window_bounds = array<i64: 128, 128>}, {pipeline_mode = #tpu.pipeline_mode<synchronous>, transform_indices = @transform_9, window_bounds = array<i64: 1, 128>}, {pipeline_mode = #tpu.pipeline_mode<synchronous>, transform_indices = @transform_10, window_bounds = array<i64: 128, 128>}, {pipeline_mode = #tpu.pipeline_mode<synchronous>, transform_indices = @transform_11, window_bounds = array<i64: 1, 128>}, {pipeline_mode = #tpu.pipeline_mode<synchronous>, transform_indices = @transform_12, window_bounds = array<i64: 128, 128>}, {pipeline_mode = #tpu.pipeline_mode<synchronous>, transform_indices = @transform_13, window_bounds = array<i64: 1, 128>}, {transform_indices = @transform_14, window_bounds = array<i64: 8, 128>}]} {
    %c0 = arith.constant 0 : index
    %c0_0 = arith.constant 0 : index
    %0 = vector.load %arg1[%c0, %c0_0] : memref<8x128xf32, #tpu.memory_space<vmem>>, vector<8x128xf32>
    %c0_1 = arith.constant 0 : index
    %c0_2 = arith.constant 0 : index
    %1 = vector.load %arg2[%c0_1, %c0_2] : memref<8x128xf32, #tpu.memory_space<vmem>>, vector<8x128xf32>
    %c0_3 = arith.constant 0 : index
    %c0_4 = arith.constant 0 : index
    %2 = vector.load %arg5[%c0_3, %c0_4] : memref<128x128xf32, #tpu.memory_space<vmem>>, vector<128x128xf32>
    %cst = arith.constant dense<0.000000e+00> : vector<8x128xf32>
    %3 = tpu.matmul %0, %2, %cst {dimension_numbers = #tpu.dot_dimension_numbers<[1], [0], [0], [1], [0, 0, 1, 1], [], []>} : vector<8x128xf32>, vector<128x128xf32>, vector<8x128xf32> -> vector<8x128xf32>
    %c0_5 = arith.constant 0 : index
    %c0_6 = arith.constant 0 : index
    %4 = vector.load %arg6[%c0_5, %c0_6] : memref<1x128xf32, #tpu.memory_space<vmem>>, vector<1x128xf32>
    %5 = vector.broadcast %4 : vector<1x128xf32> to vector<8x128xf32>
    %6 = arith.addf %3, %5 : vector<8x128xf32>
    %c0_7 = arith.constant 0 : index
    %c0_8 = arith.constant 0 : index
    %7 = vector.load %arg3[%c0_7, %c0_8] : memref<128x8xf32, #tpu.memory_space<vmem>>, vector<128x8xf32>
    %cst_9 = arith.constant dense<0.000000e+00> : vector<8x8xf32>
    %8 = tpu.matmul %6, %7, %cst_9 {dimension_numbers = #tpu.dot_dimension_numbers<[1], [0], [0], [1], [0, 0, 1, 1], [], []>} : vector<8x128xf32>, vector<128x8xf32>, vector<8x8xf32> -> vector<8x8xf32>
    %cst_10 = arith.constant dense<0xFF800000> : vector<8xf32>
    %9 = vector.multi_reduction <maximumf>, %8, %cst_10 [1] : vector<8x8xf32> to vector<8xf32>
    %10 = vector.shape_cast %9 : vector<8xf32> to vector<8x1xf32>
    %11 = vector.broadcast %10 : vector<8x1xf32> to vector<8x8xf32>
    %12 = arith.subf %8, %11 : vector<8x8xf32>
    %13 = math.exp %12 : vector<8x8xf32>
    %cst_11 = arith.constant dense<0.000000e+00> : vector<8xf32>
    %14 = vector.multi_reduction <add>, %13, %cst_11 [1] : vector<8x8xf32> to vector<8xf32>
    %15 = vector.shape_cast %14 : vector<8xf32> to vector<8x1xf32>
    %16 = vector.broadcast %15 : vector<8x1xf32> to vector<8x8xf32>
    %17 = arith.divf %13, %16 : vector<8x8xf32>
    %c0_12 = arith.constant 0 : index
    %c0_13 = arith.constant 0 : index
    %18 = vector.load %arg4[%c0_12, %c0_13] : memref<8x128xf32, #tpu.memory_space<vmem>>, vector<8x128xf32>
    %cst_14 = arith.constant dense<0.000000e+00> : vector<8x128xf32>
    %19 = tpu.matmul %17, %18, %cst_14 {dimension_numbers = #tpu.dot_dimension_numbers<[1], [0], [0], [1], [0, 0, 1, 1], [], []>} : vector<8x8xf32>, vector<8x128xf32>, vector<8x128xf32> -> vector<8x128xf32>
    %20 = tpu.concatenate %19, %1 in 1 : vector<8x128xf32>, vector<8x128xf32> -> vector<8x256xf32>
    %c0_15 = arith.constant 0 : index
    %c0_16 = arith.constant 0 : index
    %21 = vector.load %arg7[%c0_15, %c0_16] : memref<256x128xf32, #tpu.memory_space<vmem>>, vector<256x128xf32>
    %cst_17 = arith.constant dense<0.000000e+00> : vector<8x128xf32>
    %22 = tpu.matmul %20, %21, %cst_17 {dimension_numbers = #tpu.dot_dimension_numbers<[1], [0], [0], [1], [0, 0, 1, 1], [], []>} : vector<8x256xf32>, vector<256x128xf32>, vector<8x128xf32> -> vector<8x128xf32>
    %c0_18 = arith.constant 0 : index
    %c0_19 = arith.constant 0 : index
    %23 = vector.load %arg8[%c0_18, %c0_19] : memref<1x128xf32, #tpu.memory_space<vmem>>, vector<1x128xf32>
    %24 = vector.broadcast %23 : vector<1x128xf32> to vector<8x128xf32>
    %25 = arith.addf %22, %24 : vector<8x128xf32>
    %cst_20 = arith.constant 0.000000e+00 : f32
    %26 = vector.broadcast %cst_20 : f32 to vector<8x128xf32>
    %27 = arith.maximumf %25, %26 : vector<8x128xf32>
    %28 = math.absf %25 : vector<8x128xf32>
    %cst_21 = arith.constant 0.000000e+00 : f32
    %29 = vector.broadcast %cst_21 : f32 to vector<8x128xf32>
    %30 = arith.subf %29, %28 : vector<8x128xf32>
    %31 = math.exp %30 : vector<8x128xf32>
    %32 = math.log1p %31 : vector<8x128xf32>
    %33 = arith.addf %27, %32 : vector<8x128xf32>
    %c0_22 = arith.constant 0 : index
    %c0_23 = arith.constant 0 : index
    %34 = vector.load %arg9[%c0_22, %c0_23] : memref<128x128xf32, #tpu.memory_space<vmem>>, vector<128x128xf32>
    %cst_24 = arith.constant dense<0.000000e+00> : vector<8x128xf32>
    %35 = tpu.matmul %33, %34, %cst_24 {dimension_numbers = #tpu.dot_dimension_numbers<[1], [0], [0], [1], [0, 0, 1, 1], [], []>} : vector<8x128xf32>, vector<128x128xf32>, vector<8x128xf32> -> vector<8x128xf32>
    %c0_25 = arith.constant 0 : index
    %c0_26 = arith.constant 0 : index
    %36 = vector.load %arg10[%c0_25, %c0_26] : memref<1x128xf32, #tpu.memory_space<vmem>>, vector<1x128xf32>
    %37 = vector.broadcast %36 : vector<1x128xf32> to vector<8x128xf32>
    %38 = arith.addf %35, %37 : vector<8x128xf32>
    %cst_27 = arith.constant 0.000000e+00 : f32
    %39 = vector.broadcast %cst_27 : f32 to vector<8x128xf32>
    %40 = arith.maximumf %38, %39 : vector<8x128xf32>
    %41 = math.absf %38 : vector<8x128xf32>
    %cst_28 = arith.constant 0.000000e+00 : f32
    %42 = vector.broadcast %cst_28 : f32 to vector<8x128xf32>
    %43 = arith.subf %42, %41 : vector<8x128xf32>
    %44 = math.exp %43 : vector<8x128xf32>
    %45 = math.log1p %44 : vector<8x128xf32>
    %46 = arith.addf %40, %45 : vector<8x128xf32>
    %c0_29 = arith.constant 0 : index
    %c0_30 = arith.constant 0 : index
    %47 = vector.load %arg11[%c0_29, %c0_30] : memref<128x128xf32, #tpu.memory_space<vmem>>, vector<128x128xf32>
    %cst_31 = arith.constant dense<0.000000e+00> : vector<8x128xf32>
    %48 = tpu.matmul %46, %47, %cst_31 {dimension_numbers = #tpu.dot_dimension_numbers<[1], [0], [0], [1], [0, 0, 1, 1], [], []>} : vector<8x128xf32>, vector<128x128xf32>, vector<8x128xf32> -> vector<8x128xf32>
    %c0_32 = arith.constant 0 : index
    %c0_33 = arith.constant 0 : index
    %49 = vector.load %arg12[%c0_32, %c0_33] : memref<1x128xf32, #tpu.memory_space<vmem>>, vector<1x128xf32>
    %50 = vector.broadcast %49 : vector<1x128xf32> to vector<8x128xf32>
    %51 = arith.addf %48, %50 : vector<8x128xf32>
    %cst_34 = arith.constant 0.000000e+00 : f32
    %52 = vector.broadcast %cst_34 : f32 to vector<8x128xf32>
    %53 = arith.maximumf %51, %52 : vector<8x128xf32>
    %54 = math.absf %51 : vector<8x128xf32>
    %cst_35 = arith.constant 0.000000e+00 : f32
    %55 = vector.broadcast %cst_35 : f32 to vector<8x128xf32>
    %56 = arith.subf %55, %54 : vector<8x128xf32>
    %57 = math.exp %56 : vector<8x128xf32>
    %58 = math.log1p %57 : vector<8x128xf32>
    %59 = arith.addf %53, %58 : vector<8x128xf32>
    %c0_36 = arith.constant 0 : index
    %c0_37 = arith.constant 0 : index
    %60 = vector.load %arg13[%c0_36, %c0_37] : memref<128x128xf32, #tpu.memory_space<vmem>>, vector<128x128xf32>
    %cst_38 = arith.constant dense<0.000000e+00> : vector<8x128xf32>
    %61 = tpu.matmul %59, %60, %cst_38 {dimension_numbers = #tpu.dot_dimension_numbers<[1], [0], [0], [1], [0, 0, 1, 1], [], []>} : vector<8x128xf32>, vector<128x128xf32>, vector<8x128xf32> -> vector<8x128xf32>
    %c0_39 = arith.constant 0 : index
    %c0_40 = arith.constant 0 : index
    %62 = vector.load %arg14[%c0_39, %c0_40] : memref<1x128xf32, #tpu.memory_space<vmem>>, vector<1x128xf32>
    %63 = vector.broadcast %62 : vector<1x128xf32> to vector<8x128xf32>
    %64 = arith.addf %61, %63 : vector<8x128xf32>
    %c0_41 = arith.constant 0 : index
    %c0_42 = arith.constant 0 : index
    %65 = vector.load %arg15[%c0_41, %c0_42] : memref<8x128xf32, #tpu.memory_space<vmem>>, vector<8x128xf32>
    tpu.vector_store %arg15[%c0_41, %c0_42], %64 {strides = array<i32>} : memref<8x128xf32, #tpu.memory_space<vmem>>, vector<8x128xf32>,
    return
  }
  func.func @transform_0(%arg0: i32) -> (i32, i32) {
    %c0_i32 = arith.constant 0 : i32
    %c0_i32_0 = arith.constant 0 : i32
    return %arg0, %c0_i32 : i32, i32
  }
  func.func @transform_1(%arg0: i32) -> (i32, i32) {
    %c0_i32 = arith.constant 0 : i32
    %c0_i32_0 = arith.constant 0 : i32
    return %arg0, %c0_i32 : i32, i32
  }
  func.func @transform_2(%arg0: i32) -> (i32, i32) {
    %c0_i32 = arith.constant 0 : i32
    %c0_i32_0 = arith.constant 0 : i32
    %c0_i32_1 = arith.constant 0 : i32
    return %c0_i32, %c0_i32_0 : i32, i32
  }
  func.func @transform_3(%arg0: i32) -> (i32, i32) {
    %c0_i32 = arith.constant 0 : i32
    %c0_i32_0 = arith.constant 0 : i32
    %c0_i32_1 = arith.constant 0 : i32
    return %c0_i32, %c0_i32_0 : i32, i32
  }
  func.func @transform_4(%arg0: i32) -> (i32, i32) {
    %c0_i32 = arith.constant 0 : i32
    %c0_i32_0 = arith.constant 0 : i32
    %c0_i32_1 = arith.constant 0 : i32
    return %c0_i32, %c0_i32_0 : i32, i32
  }
  func.func @transform_5(%arg0: i32) -> (i32, i32) {
    %c0_i32 = arith.constant 0 : i32
    %c0_i32_0 = arith.constant 0 : i32
    %c0_i32_1 = arith.constant 0 : i32
    return %c0_i32, %c0_i32_0 : i32, i32
  }
  func.func @transform_6(%arg0: i32) -> (i32, i32) {
    %c0_i32 = arith.constant 0 : i32
    %c0_i32_0 = arith.constant 0 : i32
    %c0_i32_1 = arith.constant 0 : i32
    return %c0_i32, %c0_i32_0 : i32, i32
  }
  func.func @transform_7(%arg0: i32) -> (i32, i32) {
    %c0_i32 = arith.constant 0 : i32
    %c0_i32_0 = arith.constant 0 : i32
    %c0_i32_1 = arith.constant 0 : i32
    return %c0_i32, %c0_i32_0 : i32, i32
  }
  func.func @transform_8(%arg0: i32) -> (i32, i32) {
    %c0_i32 = arith.constant 0 : i32
    %c0_i32_0 = arith.constant 0 : i32
    %c0_i32_1 = arith.constant 0 : i32
    return %c0_i32, %c0_i32_0 : i32, i32
  }
  func.func @transform_9(%arg0: i32) -> (i32, i32) {
    %c0_i32 = arith.constant 0 : i32
    %c0_i32_0 = arith.constant 0 : i32
    %c0_i32_1 = arith.constant 0 : i32
    return %c0_i32, %c0_i32_0 : i32, i32
  }
  func.func @transform_10(%arg0: i32) -> (i32, i32) {
    %c0_i32 = arith.constant 0 : i32
    %c0_i32_0 = arith.constant 0 : i32
    %c0_i32_1 = arith.constant 0 : i32
    return %c0_i32, %c0_i32_0 : i32, i32
  }
  func.func @transform_11(%arg0: i32) -> (i32, i32) {
    %c0_i32 = arith.constant 0 : i32
    %c0_i32_0 = arith.constant 0 : i32
    %c0_i32_1 = arith.constant 0 : i32
    return %c0_i32, %c0_i32_0 : i32, i32
  }
  func.func @transform_12(%arg0: i32) -> (i32, i32) {
    %c0_i32 = arith.constant 0 : i32
    %c0_i32_0 = arith.constant 0 : i32
    %c0_i32_1 = arith.constant 0 : i32
    return %c0_i32, %c0_i32_0 : i32, i32
  }
  func.func @transform_13(%arg0: i32) -> (i32, i32) {
    %c0_i32 = arith.constant 0 : i32
    %c0_i32_0 = arith.constant 0 : i32
    %c0_i32_1 = arith.constant 0 : i32
    return %c0_i32, %c0_i32_0 : i32, i32
  }
  func.func @transform_14(%arg0: i32) -> (i32, i32) {
    %c0_i32 = arith.constant 0 : i32
    %c0_i32_0 = arith.constant 0 : i32
    return %arg0, %c0_i32 : i32, i32
  }
}

module attributes {stable_mosaic.version = 11 : i64} {
  func.func @_critic_kernel(%arg0: i32, %arg1: memref<8x128xf32, #tpu.memory_space<vmem>>, %arg2: memref<8x128xf32, #tpu.memory_space<vmem>>, %arg3: memref<128x8xf32, #tpu.memory_space<vmem>>, %arg4: memref<8x128xf32, #tpu.memory_space<vmem>>, %arg5: memref<128x128xf32, #tpu.memory_space<vmem>>, %arg6: memref<1x128xf32, #tpu.memory_space<vmem>>, %arg7: memref<256x128xf32, #tpu.memory_space<vmem>>, %arg8: memref<1x128xf32, #tpu.memory_space<vmem>>, %arg9: memref<128x128xf32, #tpu.memory_space<vmem>>, %arg10: memref<1x128xf32, #tpu.memory_space<vmem>>, %arg11: memref<128x128xf32, #tpu.memory_space<vmem>>, %arg12: memref<1x128xf32, #tpu.memory_space<vmem>>, %arg13: memref<128x128xf32, #tpu.memory_space<vmem>>, %arg14: memref<1x128xf32, #tpu.memory_space<vmem>>, %arg15: memref<8x128xf32, #tpu.memory_space<vmem>>) attributes {dimension_semantics = [#tpu.dimension_semantics<parallel>], iteration_bounds = array<i64: 1>, scalar_prefetch = 0 : i64, scratch_operands = 0 : i64, tpu.core_type = #tpu.core_type<tc>, window_params = [{transform_indices = @transform_0, window_bounds = array<i64: 8, 128>}, {transform_indices = @transform_1, window_bounds = array<i64: 8, 128>}, {pipeline_mode = #tpu.pipeline_mode<synchronous>, transform_indices = @transform_2, window_bounds = array<i64: 128, 8>}, {pipeline_mode = #tpu.pipeline_mode<synchronous>, transform_indices = @transform_3, window_bounds = array<i64: 8, 128>}, {pipeline_mode = #tpu.pipeline_mode<synchronous>, transform_indices = @transform_4, window_bounds = array<i64: 128, 128>}, {pipeline_mode = #tpu.pipeline_mode<synchronous>, transform_indices = @transform_5, window_bounds = array<i64: 1, 128>}, {pipeline_mode = #tpu.pipeline_mode<synchronous>, transform_indices = @transform_6, window_bounds = array<i64: 256, 128>}, {pipeline_mode = #tpu.pipeline_mode<synchronous>, transform_indices = @transform_7, window_bounds = array<i64: 1, 128>}, {pipeline_mode = #tpu.pipeline_mode<synchronous>, transform_indices = @transform_8, window_bounds = array<i64: 128, 128>}, {pipeline_mode = #tpu.pipeline_mode<synchronous>, transform_indices = @transform_9, window_bounds = array<i64: 1, 128>}, {pipeline_mode = #tpu.pipeline_mode<synchronous>, transform_indices = @transform_10, window_bounds = array<i64: 128, 128>}, {pipeline_mode = #tpu.pipeline_mode<synchronous>, transform_indices = @transform_11, window_bounds = array<i64: 1, 128>}, {pipeline_mode = #tpu.pipeline_mode<synchronous>, transform_indices = @transform_12, window_bounds = array<i64: 128, 128>}, {pipeline_mode = #tpu.pipeline_mode<synchronous>, transform_indices = @transform_13, window_bounds = array<i64: 1, 128>}, {transform_indices = @transform_14, window_bounds = array<i64: 8, 128>}]} {
    %c0 = arith.constant 0 : index
    %c0_0 = arith.constant 0 : index
    %0 = vector.load %arg1[%c0, %c0_0] : memref<8x128xf32, #tpu.memory_space<vmem>>, vector<8x128xf32>
    %c0_1 = arith.constant 0 : index
    %c0_2 = arith.constant 0 : index
    %1 = vector.load %arg2[%c0_1, %c0_2] : memref<8x128xf32, #tpu.memory_space<vmem>>, vector<8x128xf32>
    %c0_3 = arith.constant 0 : index
    %c0_4 = arith.constant 0 : index
    %2 = vector.load %arg5[%c0_3, %c0_4] : memref<128x128xf32, #tpu.memory_space<vmem>>, vector<128x128xf32>
    %cst = arith.constant dense<0.000000e+00> : vector<8x128xf32>
    %3 = tpu.matmul %0, %2, %cst {dimension_numbers = #tpu.dot_dimension_numbers<[1], [0], [0], [1], [0, 0, 1, 1], [], []>} : vector<8x128xf32>, vector<128x128xf32>, vector<8x128xf32> -> vector<8x128xf32>
    %c0_5 = arith.constant 0 : index
    %c0_6 = arith.constant 0 : index
    %4 = vector.load %arg6[%c0_5, %c0_6] : memref<1x128xf32, #tpu.memory_space<vmem>>, vector<1x128xf32>
    %5 = vector.broadcast %4 : vector<1x128xf32> to vector<8x128xf32>
    %6 = arith.addf %3, %5 : vector<8x128xf32>
    %c0_7 = arith.constant 0 : index
    %c0_8 = arith.constant 0 : index
    %7 = vector.load %arg3[%c0_7, %c0_8] : memref<128x8xf32, #tpu.memory_space<vmem>>, vector<128x8xf32>
    %cst_9 = arith.constant dense<0.000000e+00> : vector<8x8xf32>
    %8 = tpu.matmul %6, %7, %cst_9 {dimension_numbers = #tpu.dot_dimension_numbers<[1], [0], [0], [1], [0, 0, 1, 1], [], []>} : vector<8x128xf32>, vector<128x8xf32>, vector<8x8xf32> -> vector<8x8xf32>
    %cst_10 = arith.constant dense<0xFF800000> : vector<8xf32>
    %9 = vector.multi_reduction <maximumf>, %8, %cst_10 [1] : vector<8x8xf32> to vector<8xf32>
    %10 = vector.shape_cast %9 : vector<8xf32> to vector<8x1xf32>
    %11 = vector.broadcast %10 : vector<8x1xf32> to vector<8x8xf32>
    %12 = arith.subf %8, %11 : vector<8x8xf32>
    %13 = math.exp %12 : vector<8x8xf32>
    %cst_11 = arith.constant dense<0.000000e+00> : vector<8xf32>
    %14 = vector.multi_reduction <add>, %13, %cst_11 [1] : vector<8x8xf32> to vector<8xf32>
    %15 = vector.shape_cast %14 : vector<8xf32> to vector<8x1xf32>
    %16 = vector.broadcast %15 : vector<8x1xf32> to vector<8x8xf32>
    %17 = arith.divf %13, %16 : vector<8x8xf32>
    %c0_12 = arith.constant 0 : index
    %c0_13 = arith.constant 0 : index
    %18 = vector.load %arg4[%c0_12, %c0_13] : memref<8x128xf32, #tpu.memory_space<vmem>>, vector<8x128xf32>
    %cst_14 = arith.constant dense<0.000000e+00> : vector<8x128xf32>
    %19 = tpu.matmul %17, %18, %cst_14 {dimension_numbers = #tpu.dot_dimension_numbers<[1], [0], [0], [1], [0, 0, 1, 1], [], []>} : vector<8x8xf32>, vector<8x128xf32>, vector<8x128xf32> -> vector<8x128xf32>
    %20 = tpu.concatenate %19, %1 in 1 : vector<8x128xf32>, vector<8x128xf32> -> vector<8x256xf32>
    %c0_15 = arith.constant 0 : index
    %c0_16 = arith.constant 0 : index
    %21 = vector.load %arg7[%c0_15, %c0_16] : memref<256x128xf32, #tpu.memory_space<vmem>>, vector<256x128xf32>
    %cst_17 = arith.constant dense<0.000000e+00> : vector<8x128xf32>
    %22 = tpu.matmul %20, %21, %cst_17 {dimension_numbers = #tpu.dot_dimension_numbers<[1], [0], [0], [1], [0, 0, 1, 1], [], []>} : vector<8x256xf32>, vector<256x128xf32>, vector<8x128xf32> -> vector<8x128xf32>
    %c0_18 = arith.constant 0 : index
    %c0_19 = arith.constant 0 : index
    %23 = vector.load %arg8[%c0_18, %c0_19] : memref<1x128xf32, #tpu.memory_space<vmem>>, vector<1x128xf32>
    %24 = vector.broadcast %23 : vector<1x128xf32> to vector<8x128xf32>
    %25 = arith.addf %22, %24 : vector<8x128xf32>
    %cst_20 = arith.constant 0.000000e+00 : f32
    %26 = vector.broadcast %cst_20 : f32 to vector<8x128xf32>
    %27 = arith.maximumf %25, %26 : vector<8x128xf32>
    %28 = math.absf %25 : vector<8x128xf32>
    %cst_21 = arith.constant 0.000000e+00 : f32
    %29 = vector.broadcast %cst_21 : f32 to vector<8x128xf32>
    %30 = arith.subf %29, %28 : vector<8x128xf32>
    %31 = math.exp %30 : vector<8x128xf32>
    %32 = math.log1p %31 : vector<8x128xf32>
    %33 = arith.addf %27, %32 : vector<8x128xf32>
    %c0_22 = arith.constant 0 : index
    %c0_23 = arith.constant 0 : index
    %34 = vector.load %arg9[%c0_22, %c0_23] : memref<128x128xf32, #tpu.memory_space<vmem>>, vector<128x128xf32>
    %cst_24 = arith.constant dense<0.000000e+00> : vector<8x128xf32>
    %35 = tpu.matmul %33, %34, %cst_24 {dimension_numbers = #tpu.dot_dimension_numbers<[1], [0], [0], [1], [0, 0, 1, 1], [], []>} : vector<8x128xf32>, vector<128x128xf32>, vector<8x128xf32> -> vector<8x128xf32>
    %c0_25 = arith.constant 0 : index
    %c0_26 = arith.constant 0 : index
    %36 = vector.load %arg10[%c0_25, %c0_26] : memref<1x128xf32, #tpu.memory_space<vmem>>, vector<1x128xf32>
    %37 = vector.broadcast %36 : vector<1x128xf32> to vector<8x128xf32>
    %38 = arith.addf %35, %37 : vector<8x128xf32>
    %cst_27 = arith.constant 0.000000e+00 : f32
    %39 = vector.broadcast %cst_27 : f32 to vector<8x128xf32>
    %40 = arith.maximumf %38, %39 : vector<8x128xf32>
    %41 = math.absf %38 : vector<8x128xf32>
    %cst_28 = arith.constant 0.000000e+00 : f32
    %42 = vector.broadcast %cst_28 : f32 to vector<8x128xf32>
    %43 = arith.subf %42, %41 : vector<8x128xf32>
    %44 = math.exp %43 : vector<8x128xf32>
    %45 = math.log1p %44 : vector<8x128xf32>
    %46 = arith.addf %40, %45 : vector<8x128xf32>
    %c0_29 = arith.constant 0 : index
    %c0_30 = arith.constant 0 : index
    %47 = vector.load %arg11[%c0_29, %c0_30] : memref<128x128xf32, #tpu.memory_space<vmem>>, vector<128x128xf32>
    %cst_31 = arith.constant dense<0.000000e+00> : vector<8x128xf32>
    %48 = tpu.matmul %46, %47, %cst_31 {dimension_numbers = #tpu.dot_dimension_numbers<[1], [0], [0], [1], [0, 0, 1, 1], [], []>} : vector<8x128xf32>, vector<128x128xf32>, vector<8x128xf32> -> vector<8x128xf32>
    %c0_32 = arith.constant 0 : index
    %c0_33 = arith.constant 0 : index
    %49 = vector.load %arg12[%c0_32, %c0_33] : memref<1x128xf32, #tpu.memory_space<vmem>>, vector<1x128xf32>
    %50 = vector.broadcast %49 : vector<1x128xf32> to vector<8x128xf32>
    %51 = arith.addf %48, %50 : vector<8x128xf32>
    %cst_34 = arith.constant 0.000000e+00 : f32
    %52 = vector.broadcast %cst_34 : f32 to vector<8x128xf32>
    %53 = arith.maximumf %51, %52 : vector<8x128xf32>
    %54 = math.absf %51 : vector<8x128xf32>
    %cst_35 = arith.constant 0.000000e+00 : f32
    %55 = vector.broadcast %cst_35 : f32 to vector<8x128xf32>
    %56 = arith.subf %55, %54 : vector<8x128xf32>
    %57 = math.exp %56 : vector<8x128xf32>
    %58 = math.log1p %57 : vector<8x128xf32>
    %59 = arith.addf %53, %58 : vector<8x128xf32>
    %c0_36 = arith.constant 0 : index
    %c0_37 = arith.constant 0 : index
    %60 = vector.load %arg13[%c0_36, %c0_37] : memref<128x128xf32, #tpu.memory_space<vmem>>, vector<128x128xf32>
    %cst_38 = arith.constant dense<0.000000e+00> : vector<8x128xf32>
    %61 = tpu.matmul %59, %60, %cst_38 {dimension_numbers = #tpu.dot_dimension_numbers<[1], [0], [0], [1], [0, 0, 1, 1], [], []>} : vector<8x128xf32>, vector<128x128xf32>, vector<8x128xf32> -> vector<8x128xf32>
    %c0_39 = arith.constant 0 : index
    %c0_40 = arith.constant 0 : index
    %62 = vector.load %arg14[%c0_39, %c0_40] : memref<1x128xf32, #tpu.memory_space<vmem>>, vector<1x128xf32>
    %63 = vector.broadcast %62 : vector<1x128xf32> to vector<8x128xf32>
    %64 = arith.addf %61, %63 : vector<8x128xf32>
    %c0_41 = arith.constant 0 : index
    %c0_42 = arith.constant 0 : index
    %65 = vector.load %arg15[%c0_41, %c0_42] : memref<8x128xf32, #tpu.memory_space<vmem>>, vector<8x128xf32>
    tpu.vector_store %arg15[%c0_41, %c0_42], %64 {strides = array<i32>} : memref<8x128xf32, #tpu.memory_space<vmem>>, vector<8x128xf32>,
    return
  }
  func.func @transform_0(%arg0: i32) -> (i32, i32) {
    %c0_i32 = arith.constant 0 : i32
    %c0_i32_0 = arith.constant 0 : i32
    return %arg0, %c0_i32 : i32, i32
  }
  func.func @transform_1(%arg0: i32) -> (i32, i32) {
    %c0_i32 = arith.constant 0 : i32
    %c0_i32_0 = arith.constant 0 : i32
    return %arg0, %c0_i32 : i32, i32
  }
  func.func @transform_2(%arg0: i32) -> (i32, i32) {
    %c0_i32 = arith.constant 0 : i32
    %c0_i32_0 = arith.constant 0 : i32
    %c0_i32_1 = arith.constant 0 : i32
    return %c0_i32, %c0_i32_0 : i32, i32
  }
  func.func @transform_3(%arg0: i32) -> (i32, i32) {
    %c0_i32 = arith.constant 0 : i32
    %c0_i32_0 = arith.constant 0 : i32
    %c0_i32_1 = arith.constant 0 : i32
    return %c0_i32, %c0_i32_0 : i32, i32
  }
  func.func @transform_4(%arg0: i32) -> (i32, i32) {
    %c0_i32 = arith.constant 0 : i32
    %c0_i32_0 = arith.constant 0 : i32
    %c0_i32_1 = arith.constant 0 : i32
    return %c0_i32, %c0_i32_0 : i32, i32
  }
  func.func @transform_5(%arg0: i32) -> (i32, i32) {
    %c0_i32 = arith.constant 0 : i32
    %c0_i32_0 = arith.constant 0 : i32
    %c0_i32_1 = arith.constant 0 : i32
    return %c0_i32, %c0_i32_0 : i32, i32
  }
  func.func @transform_6(%arg0: i32) -> (i32, i32) {
    %c0_i32 = arith.constant 0 : i32
    %c0_i32_0 = arith.constant 0 : i32
    %c0_i32_1 = arith.constant 0 : i32
    return %c0_i32, %c0_i32_0 : i32, i32
  }
  func.func @transform_7(%arg0: i32) -> (i32, i32) {
    %c0_i32 = arith.constant 0 : i32
    %c0_i32_0 = arith.constant 0 : i32
    %c0_i32_1 = arith.constant 0 : i32
    return %c0_i32, %c0_i32_0 : i32, i32
  }
  func.func @transform_8(%arg0: i32) -> (i32, i32) {
    %c0_i32 = arith.constant 0 : i32
    %c0_i32_0 = arith.constant 0 : i32
    %c0_i32_1 = arith.constant 0 : i32
    return %c0_i32, %c0_i32_0 : i32, i32
  }
  func.func @transform_9(%arg0: i32) -> (i32, i32) {
    %c0_i32 = arith.constant 0 : i32
    %c0_i32_0 = arith.constant 0 : i32
    %c0_i32_1 = arith.constant 0 : i32
    return %c0_i32, %c0_i32_0 : i32, i32
  }
  func.func @transform_10(%arg0: i32) -> (i32, i32) {
    %c0_i32 = arith.constant 0 : i32
    %c0_i32_0 = arith.constant 0 : i32
    %c0_i32_1 = arith.constant 0 : i32
    return %c0_i32, %c0_i32_0 : i32, i32
  }
  func.func @transform_11(%arg0: i32) -> (i32, i32) {
    %c0_i32 = arith.constant 0 : i32
    %c0_i32_0 = arith.constant 0 : i32
    %c0_i32_1 = arith.constant 0 : i32
    return %c0_i32, %c0_i32_0 : i32, i32
  }
  func.func @transform_12(%arg0: i32) -> (i32, i32) {
    %c0_i32 = arith.constant 0 : i32
    %c0_i32_0 = arith.constant 0 : i32
    %c0_i32_1 = arith.constant 0 : i32
    return %c0_i32, %c0_i32_0 : i32, i32
  }
  func.func @transform_13(%arg0: i32) -> (i32, i32) {
    %c0_i32 = arith.constant 0 : i32
    %c0_i32_0 = arith.constant 0 : i32
    %c0_i32_1 = arith.constant 0 : i32
    return %c0_i32, %c0_i32_0 : i32, i32
  }
  func.func @transform_14(%arg0: i32) -> (i32, i32) {
    %c0_i32 = arith.constant 0 : i32
    %c0_i32_0 = arith.constant 0 : i32
    return %arg0, %c0_i32 : i32, i32
  }
}

</mosaic_0001>

<bundles_post_ra>
// kernel: tpu_custom_call.1
= control target key start
LH: loop header
LB: loop body
LE: loop exit
PB: predicated region body
PF: predicated region fallthrough
CT: control target
= control target key end

     0   :  { %19 = vsyncpa [#allocation3], 0  ;;  %s962_s0 = inlined_call_operand.vmem [shape: f32[8,128], index: 0, kind: input, shape index: {}]   ;;  %s963_s1 = inlined_call_operand.hbm [shape: f32[8,128], index: 1, kind: input, shape index: {}]   ;;  %s964_s2 = inlined_call_operand.vmem [shape: f32[128,8], index: 2, kind: input, shape index: {}]   ;;  %s965_s3 = inlined_call_operand.hbm [shape: f32[8,128], index: 3, kind: input, shape index: {}]   ;;  %s966_s4 = inlined_call_operand.vmem [shape: f32[128,128], index: 4, kind: input, shape index: {}]   ;;  %s967_s5 = inlined_call_operand.vmem [shape: f32[1,128], index: 5, kind: input, shape index: {}]   ;;  %s968_s6 = inlined_call_operand.hbm [shape: f32[256,128], index: 6, kind: input, shape index: {}]   ;;  %s969_s7 = inlined_call_operand.vmem [shape: f32[1,128], index: 7, kind: input, shape index: {}]   ;;  %s970_s8 = inlined_call_operand.hbm [shape: f32[128,128], index: 8, kind: input, shape index: {}]   ;;  %s971_s9 = inlined_call_operand.vmem [shape: f32[1,128], index: 9, kind: input, shape index: {}]   ;;  %s972_s10 = inlined_call_operand.hbm [shape: f32[128,128], index: 10, kind: input, shape index: {}]   ;;  %s973_s11 = inlined_call_operand.vmem [shape: f32[1,128], index: 11, kind: input, shape index: {}]   ;;  %s974_s12 = inlined_call_operand.hbm [shape: f32[128,128], index: 12, kind: input, shape index: {}]   ;;  %s975_s13 = inlined_call_operand.vmem [shape: f32[1,128], index: 13, kind: input, shape index: {}]   ;;  %s976_s14 = inlined_call_operand.hbm [shape: f32[8,128], index: 14, kind: output, shape index: {}]  }
   0x1   :  { %20 = vsyncpa [#allocation6], 0 }
   0x2   :  { %21 = vsyncpa [#allocation9], 0 }
   0x3   :  { %22 = vsyncpa [#allocation12], 0  ;;  %s44_s15 = sshll.u32 %s965_s3, 4  ;;  %s45_s15 = int_to_ptr.hbm [resolvable:$true] %s44_s15 }
   0x4   :  { %23 = vsyncpa [#allocation4], 0  ;;  %s736_s16 = smov [#allocation5]   ;;  %s73_s20 = sshll.u32 %s970_s8, 4  ;;  %s74_s20 = int_to_ptr.hbm [resolvable:$true] %s73_s20 }
   0x5   :  { %s46_s17 = sshll.u32 %s736_s16, 4  ;;  %s737_s21 = smov [#allocation8]   ;;  %s47_s17 = int_to_ptr.vmem [resolvable:$true] %s46_s17 }
   0x6   :  { %49 = dma.hbm_to_vmem [thread:$0]  %s45_s15, 128, %s47_s17, [#allocation6]  }
   0x7   :  { %s75_s22 = sshll.u32 %s737_s21, 4  ;;  %s31_s25 = sshll.u32 %s963_s1, 4  ;;  %s76_s22 = int_to_ptr.vmem [resolvable:$true] %s75_s22  ;;  %s32_s25 = int_to_ptr.hbm [resolvable:$true] %s31_s25 }
   0x8   :  { %s738_s3 = smov 128   ;;  %s739_s26 = smov 8  }
   0x9   :  { %81 = dma.hbm_to_vmem [thread:$0]  %s74_s20, 2048, %s76_s22, [#allocation9], %s738_s3, %s738_s3, %s739_s26  }
   0xa   :  { %s58_s29 = sshll.u32 %s968_s6, 4  ;;  %s740_s30 = smov [#allocation2]   ;;  %s59_s29 = int_to_ptr.hbm [resolvable:$true] %s58_s29 }
   0xb   :  { %s33_s15 = sshll.u32 %s740_s30, 4  ;;  %s741_s8 = smov [#allocation7]   ;;  %s34_s15 = int_to_ptr.vmem [resolvable:$true] %s33_s15 }
   0xc   :  { %36 = dma.hbm_to_vmem [thread:$0]  %s32_s25, 128, %s34_s15, [#allocation3]  }
   0xd   :  { %s60_s16 = sshll.u32 %s741_s8, 4  ;;  %s88_s1 = sshll.u32 %s972_s10, 4  ;;  %s61_s16 = int_to_ptr.vmem [resolvable:$true] %s60_s16  ;;  %s89_s1 = int_to_ptr.hbm [resolvable:$true] %s88_s1 }
   0xe   :  { %66 = dma.hbm_to_vmem [thread:$0]  %s59_s29, 4096, %s61_s16, [#allocation6], %s738_s3, %s738_s3, %s739_s26  }
   0xf   :  { %s103_s21 = sshll.u32 %s974_s12, 4  ;;  %s742_s22 = smov [#allocation10]   ;;  %s104_s21 = int_to_ptr.hbm [resolvable:$true] %s103_s21 }
  0x10   :  { %s90_s6 = sshll.u32 %s742_s22, 4  ;;  %s743_s23 = smov [#allocation11]   ;;  %s91_s6 = int_to_ptr.vmem [resolvable:$true] %s90_s6 }
  0x11   :  { %96 = dma.hbm_to_vmem [thread:$0]  %s89_s1, 2048, %s91_s6, [#allocation9], %s738_s3, %s738_s3, %s739_s26  }
  0x12   :  { %s105_s24 = sshll.u32 %s743_s23, 4  ;;  %s106_s24 = int_to_ptr.vmem [resolvable:$true] %s105_s24 }
  0x13   :  { %111 = dma.hbm_to_vmem [thread:$0]  %s104_s21, 2048, %s106_s24, [#allocation12], %s738_s3, %s738_s3, %s739_s26  }
  0x14   :  { %726 = dma.done.wait [#allocation3], 128  }
  0x15   :  { %727 = vsyncadd [#allocation3], 4294967168 }
  0x16   :  { %728 = dma.done.wait [#allocation6], 4224  }
  0x17   :  { %729 = vsyncadd [#allocation6], 4294963072 }
  0x18   :  { %730 = dma.done.wait [#allocation9], 4096  }
  0x19   :  { %731 = vsyncadd [#allocation9], 4294963200 }
  0x1a   :  { %732 = dma.done.wait [#allocation12], 2048  }
  0x1b   :  { %733 = vsyncadd [#allocation12], 4294965248  ;;  %v155_v0 = vld [vmem:[%s966_s4 + $0x78] sm:$0xff]  ;;  %v154_v1 = vld [vmem:[%s966_s4 + $0x70] sm:$0xff]  ;;  %vm216_vm0 = vcmask 64512   ;;  %s744_s27 = smov [#allocation13]  }
  0x1c   :  { %160 = vmatpush.msra.mxu0 %v155_v0  ;;  %v153_v2 = vld [vmem:[%s966_s4 + $0x68] sm:$0xff]  ;;  %v152_v3 = vld [vmem:[%s966_s4 + $0x60] sm:$0xff]  ;;  %v195_v4 = vld [vmem:[%s964_s2 + $0x78] sm:$0xff]  ;;  %s512_s28 = sshll.u32 %s744_s27, 4  ;;  %s514_s26 = sshll.u32 %s976_s14, 4  ;;  %s513_s28 = int_to_ptr.vmem [resolvable:$true] %s512_s28  ;;  %s515_s26 = int_to_ptr.hbm [resolvable:$true] %s514_s26 }
  0x1d   :  { %v151_v5 = vld [vmem:[%s966_s4 + $0x58] sm:$0xff]  ;;  %196 = vmatpush.msra.mxu1 %v195_v4  ;;  %v194_v6 = vld [vmem:[%s964_s2 + $0x70] sm:$0xff]  ;;  %v193_v7 = vld [vmem:[%s964_s2 + $0x68] sm:$0xff] }
  0x1e   :  { %161 = vmatpush.msra.mxu0 %v154_v1  ;;  %v150_v8 = vld [vmem:[%s966_s4 + $0x50] sm:$0xff]  ;;  %v192_v9 = vld [vmem:[%s964_s2 + $0x60] sm:$0xff]  ;;  %v149_v10 = vld [vmem:[%s966_s4 + $0x48] sm:$0xff] }
  0x1f   :  { %197 = vmatpush.msra.mxu1 %v194_v6  ;;  %v191_v11 = vld [vmem:[%s964_s2 + $0x58] sm:$0xff]  ;;  %v148_v12 = vld [vmem:[%s966_s4 + $0x40] sm:$0xff]  ;;  %v190_v13 = vld [vmem:[%s964_s2 + $0x50] sm:$0xff] }
  0x20   :  { %162 = vmatpush.msra.mxu0 %v153_v2  ;;  %v147_v14 = vld [vmem:[%s966_s4 + $0x38] sm:$0xff]  ;;  %v189_v15 = vld [vmem:[%s964_s2 + $0x48] sm:$0xff]  ;;  %v146_v16 = vld [vmem:[%s966_s4 + $0x30] sm:$0xff] }
  0x21   :  { %198 = vmatpush.msra.mxu1 %v193_v7  ;;  %v188_v17 = vld [vmem:[%s964_s2 + $0x40] sm:$0xff]  ;;  %v145_v18 = vld [vmem:[%s966_s4 + $0x28] sm:$0xff]  ;;  %v187_v19 = vld [vmem:[%s964_s2 + $0x38] sm:$0xff] }
  0x22   :  { %163 = vmatpush.msra.mxu0 %v152_v3  ;;  %v144_v20 = vld [vmem:[%s966_s4 + $0x20] sm:$0xff]  ;;  %v186_v21 = vld [vmem:[%s964_s2 + $0x30] sm:$0xff]  ;;  %v143_v22 = vld [vmem:[%s966_s4 + $0x18] sm:$0xff] }
  0x23   :  { %199 = vmatpush.msra.mxu1 %v192_v9  ;;  %v185_v23 = vld [vmem:[%s964_s2 + $0x28] sm:$0xff]  ;;  %v142_v24 = vld [vmem:[%s966_s4 + $0x10] sm:$0xff]  ;;  %v184_v25 = vld [vmem:[%s964_s2 + $0x20] sm:$0xff] }
  0x24   :  { %164 = vmatpush.msra.mxu0 %v151_v5  ;;  %v141_v26 = vld [vmem:[%s966_s4 + $0x8] sm:$0xff]  ;;  %v183_v27 = vld [vmem:[%s964_s2 + $0x18] sm:$0xff]  ;;  %v140_v28 = vld [vmem:[%s966_s4] sm:$0xff] }
  0x25   :  { %200 = vmatpush.msra.mxu1 %v191_v11  ;;  %v138_v29 = vld [vmem:[%s962_s0] sm:$0xff]  ;;  %v182_v30 = vld [vmem:[%s964_s2 + $0x10] sm:$0xff]  ;;  %v181_v31 = vld [vmem:[%s964_s2 + $0x8] sm:$0xff] }
  0x26   :  { %165 = vmatpush.msra.mxu0 %v150_v8  ;;  %v180_v32 = vld [vmem:[%s964_s2] sm:$0xff]  ;;  %v241_v43 = vld [vmem:[#allocation5] sm:$0xff]  ;;  %v278_v48 = vld [vmem:[#allocation7 + $0x68] sm:$0xff] }
  0x27   :  { %201 = vmatpush.msra.mxu1 %v190_v13  ;;  %v537_v33 = vld [vmem:[%s967_s5] ss:$0 sm:$0xff]  ;;  %260 = vmatpush.msra.mxu2 %v241_v43  ;;  %v280_v44 = vld [vmem:[#allocation7 + $0x78] sm:$0xff]  ;;  %v294_v49 = vld [vmem:[#allocation7 + $0xe8] sm:$0xff] }
  0x28   :  { %166 = vmatpush.msra.mxu0 %v149_v10  ;;  %v279_v45 = vld [vmem:[#allocation7 + $0x70] sm:$0xff]  ;;  %v296_v46 = vld [vmem:[#allocation7 + $0xf8] sm:$0xff]  ;;  %301 = vmatpush.msra.mxu3 %v280_v44  ;;  %v277_v50 = vld [vmem:[#allocation7 + $0x60] sm:$0xff] }
  0x29   :  { %202 = vmatpush.msra.mxu1 %v189_v15  ;;  %321 = vmatpush.msrb.mxu2 %v296_v46  ;;  %v295_v47 = vld [vmem:[#allocation7 + $0xf0] sm:$0xff]  ;;  %v293_v51 = vld [vmem:[#allocation7 + $0xe0] sm:$0xff]  ;;  %v276_v52 = vld [vmem:[#allocation7 + $0x58] sm:$0xff] }
  0x2a   :  { %167 = vmatpush.msra.mxu0 %v148_v12  ;;  %302 = vmatpush.msra.mxu3 %v279_v45  ;;  %v292_v53 = vld [vmem:[#allocation7 + $0xd8] sm:$0xff]  ;;  %v275_v54 = vld [vmem:[#allocation7 + $0x50] sm:$0xff]  ;;  %v274_v56 = vld [vmem:[#allocation7 + $0x48] sm:$0xff] }
  0x2b   :  { %203 = vmatpush.msra.mxu1 %v188_v17  ;;  %322 = vmatpush.msrb.mxu2 %v295_v47  ;;  %v291_v55 = vld [vmem:[#allocation7 + $0xd0] sm:$0xff]  ;;  %v290_v57 = vld [vmem:[#allocation7 + $0xc8] sm:$0xff]  ;;  %v273_v59 = vld [vmem:[#allocation7 + $0x40] sm:$0xff] }
  0x2c   :  { %168 = vmatpush.msra.mxu0 %v147_v14  ;;  %303 = vmatpush.msra.mxu3 %v278_v48  ;;  %v289_v60 = vld [vmem:[#allocation7 + $0xc0] sm:$0xff]  ;;  %v272_v61 = vld [vmem:[#allocation7 + $0x38] sm:$0xff]  ;;  %v271_v63 = vld [vmem:[#allocation7 + $0x30] sm:$0xff] }
  0x2d   :  { %204 = vmatpush.msra.mxu1 %v187_v19  ;;  %323 = vmatpush.msrb.mxu2 %v294_v49  ;;  %v288_v62 = vld [vmem:[#allocation7 + $0xb8] sm:$0xff]  ;;  %v287_v0 = vld [vmem:[#allocation7 + $0xb0] sm:$0xff]  ;;  %v270_v1 = vld [vmem:[#allocation7 + $0x28] sm:$0xff] }
  0x2e   :  { %169 = vmatpush.msra.mxu0 %v146_v16  ;;  %304 = vmatpush.msra.mxu3 %v277_v50  ;;  %v286_v2 = vld [vmem:[#allocation7 + $0xa8] sm:$0xff]  ;;  %v269_v5 = vld [vmem:[#allocation7 + $0x20] sm:$0xff]  ;;  %v268_v8 = vld [vmem:[#allocation7 + $0x18] sm:$0xff] }
  0x2f   :  { %205 = vmatpush.msra.mxu1 %v186_v21  ;;  %324 = vmatpush.msrb.mxu2 %v293_v51  ;;  %v285_v6 = vld [vmem:[#allocation7 + $0xa0] sm:$0xff]  ;;  %v284_v9 = vld [vmem:[#allocation7 + $0x98] sm:$0xff]  ;;  %v267_v13 = vld [vmem:[#allocation7 + $0x10] sm:$0xff] }
  0x30   :  { %170 = vmatpush.msra.mxu0 %v145_v18  ;;  %305 = vmatpush.msra.mxu3 %v276_v52  ;;  %v283_v14 = vld [vmem:[#allocation7 + $0x90] sm:$0xff]  ;;  %v266_v16 = vld [vmem:[#allocation7 + $0x8] sm:$0xff]  ;;  %v265_v21 = vld [vmem:[#allocation7] sm:$0xff] }
  0x31   :  { %206 = vmatpush.msra.mxu1 %v185_v23  ;;  %325 = vmatpush.msrb.mxu2 %v292_v53  ;;  %v281_v23 = vld [vmem:[#allocation7 + $0x80] sm:$0xff]  ;;  %v426_v45 = vld [vmem:[#allocation10 + $0x78] sm:$0xff] }
  0x32   :  { %171 = vmatpush.msra.mxu0 %v144_v20  ;;  %306 = vmatpush.msra.mxu3 %v275_v54 }
  0x33   :  { %207 = vmatpush.msra.mxu1 %v184_v25  ;;  %326 = vmatpush.msrb.mxu2 %v291_v55 }
  0x34   :  { %172 = vmatpush.msra.mxu0 %v143_v22  ;;  %307 = vmatpush.msra.mxu3 %v274_v56  ;;  %v282_v22 = vld [vmem:[#allocation7 + $0x88] sm:$0xff] }
  0x35   :  { %208 = vmatpush.msra.mxu1 %v183_v27  ;;  %327 = vmatpush.msrb.mxu2 %v290_v57  ;;  %v370_v27 = vld [vmem:[#allocation8 + $0x70] sm:$0xff] }
  0x36   :  { %173 = vmatpush.msra.mxu0 %v142_v24  ;;  %308 = vmatpush.msra.mxu3 %v273_v59  ;;  %v139_v24 = vld [vmem:[#allocation2] sm:$0xff] }
  0x37   :  { %209 = vmatpush.msra.mxu1 %v182_v30  ;;  %328 = vmatpush.msrb.mxu2 %v289_v60  ;;  %v367_v30 = vld [vmem:[#allocation8 + $0x58] sm:$0xff] }
  0x38   :  { %174 = vmatpush.msra.mxu0 %v141_v26  ;;  %309 = vmatpush.msra.mxu3 %v272_v61  ;;  %v371_v26 = vld [vmem:[#allocation8 + $0x78] sm:$0xff] }
  0x39   :  { %210 = vmatpush.msra.mxu1 %v181_v31  ;;  %329 = vmatpush.msrb.mxu2 %v288_v62  ;;  %v366_v31 = vld [vmem:[#allocation8 + $0x50] sm:$0xff] }
  0x3a   :  { %175 = vmatpush.msra.mxu0 %v140_v28  ;;  %310 = vmatpush.msra.mxu3 %v271_v63  ;;  %v369_v28 = vld [vmem:[#allocation8 + $0x68] sm:$0xff]  ;;  %v425_v62 = vld [vmem:[#allocation10 + $0x70] sm:$0xff] }
  0x3b   :  { %176 = vmatmul.f32.vlgmr.msra.gmra.mxu0 %v138_v29  ;;  %211 = vmatpush.msra.mxu1 %v180_v32  ;;  %v368_v29 = vld [vmem:[#allocation8 + $0x60] sm:$0xff]  ;;  %v365_v32 = vld [vmem:[#allocation8 + $0x48] sm:$0xff] }
  0x3c   :  { %330 = vmatpush.msrb.mxu2 %v287_v0  ;;  %311 = vmatpush.msra.mxu3 %v270_v1  ;;  %v424_v63 = vld [vmem:[#allocation10 + $0x68] sm:$0xff]  ;;  %v423_v0 = vld [vmem:[#allocation10 + $0x60] sm:$0xff]  ;;  %v422_v1 = vld [vmem:[#allocation10 + $0x58] sm:$0xff] }
  0x3d   :  { %376 = vmatpush.msrb.mxu0 %v371_v26  ;;  %431 = vmatpush.msrb.mxu1 %v426_v45  ;;  %v466_v45 = vld [vmem:[#allocation11] sm:$0xff] }
  0x3e   :  { %331 = vmatpush.msrb.mxu2 %v286_v2  ;;  %312 = vmatpush.msra.mxu3 %v269_v5  ;;  %v421_v2 = vld [vmem:[#allocation10 + $0x50] sm:$0xff]  ;;  %v418_v5 = vld [vmem:[#allocation10 + $0x38] sm:$0xff] }
  0x3f   :  { %377 = vmatpush.msrb.mxu0 %v370_v27  ;;  %432 = vmatpush.msrb.mxu1 %v425_v62 }
  0x40   :  { %332 = vmatpush.msrb.mxu2 %v285_v6  ;;  %313 = vmatpush.msra.mxu3 %v268_v8  ;;  %v417_v6 = vld [vmem:[#allocation10 + $0x30] sm:$0xff]  ;;  %v415_v8 = vld [vmem:[#allocation10 + $0x20] sm:$0xff] }
  0x41   :  { %378 = vmatpush.msrb.mxu0 %v369_v28  ;;  %433 = vmatpush.msrb.mxu1 %v424_v63  ;;  %v541_v63 = vld [vmem:[%s975_s13] ss:$0 sm:$0xff] }
  0x42   :  { %333 = vmatpush.msrb.mxu2 %v284_v9  ;;  %314 = vmatpush.msra.mxu3 %v267_v13  ;;  %v414_v9 = vld [vmem:[#allocation10 + $0x18] sm:$0xff]  ;;  %v539_v13 = vld [vmem:[%s971_s9] ss:$0 sm:$0xff] }
  0x43   :  { %379 = vmatpush.msrb.mxu0 %v368_v29  ;;  %434 = vmatpush.msrb.mxu1 %v423_v0 }
  0x44   :  { %334 = vmatpush.msrb.mxu2 %v283_v14  ;;  %315 = vmatpush.msra.mxu3 %v266_v16  ;;  %v481_v14 = vld [vmem:[#allocation11 + $0x78] sm:$0xff] }
  0x45   :  { %380 = vmatpush.msrb.mxu0 %v367_v30  ;;  %435 = vmatpush.msrb.mxu1 %v422_v1 }
  0x46   :  { %316 = vmatpush.msra.mxu3 %v265_v21  ;;  %335 = vmatpush.msrb.mxu2 %v282_v22 }
  0x47   :  { %381 = vmatpush.msrb.mxu0 %v366_v31  ;;  %436 = vmatpush.msrb.mxu1 %v421_v2  ;;  %v480_v31 = vld [vmem:[#allocation11 + $0x70] sm:$0xff] }
  0x48   :  { %336 = vmatpush.msrb.mxu2 %v281_v23  ;;  %486 = vmatpush.msrb.mxu3 %v481_v14 }
  0x49   :  { %382 = vmatpush.msrb.mxu0 %v365_v32  ;;  %v479_v32 = vld [vmem:[#allocation11 + $0x68] sm:$0xff] }
  0x4a   :  { %487 = vmatpush.msrb.mxu3 %v480_v31 }
  0x4c   :  { %488 = vmatpush.msrb.mxu3 %v479_v32 }
  0xb8   :  { %v177_v34 = vpop.f32.mrf.mxu0 }
  0xb9   :  { %v178_v35 = vadd.f32 %v537_v33, %v177_v34  ;;  %v364_v33 = vld [vmem:[#allocation8 + $0x40] sm:$0xff]  ;;  %v363_v34 = vld [vmem:[#allocation8 + $0x38] sm:$0xff] }
  0xba   :  { %383 = vmatpush.msrb.mxu0 %v364_v33  ;;  %v478_v33 = vld [vmem:[#allocation11 + $0x60] sm:$0xff] }
  0xbb   :  { %212 = vmatmul.f32.vlgmr.msra.gmra.mxu1 %v178_v35  ;;  %v362_v35 = vld [vmem:[#allocation8 + $0x30] sm:$0xff]  ;;  %489 = vmatpush.msrb.mxu3 %v478_v33 }
  0xbc   :  { %384 = vmatpush.msrb.mxu0 %v363_v34  ;;  %v477_v34 = vld [vmem:[#allocation11 + $0x58] sm:$0xff] }
  0xbd   :  { %490 = vmatpush.msrb.mxu3 %v477_v34 }
  0xbe   :  { %385 = vmatpush.msrb.mxu0 %v362_v35  ;;  %v476_v35 = vld [vmem:[#allocation11 + $0x50] sm:$0xff] }
  0xbf   :  { %491 = vmatpush.msrb.mxu3 %v476_v35 }
 0x138   :  { %v213_v36 = vpop.f32.mrf.mxu1 }
 0x139   :  { %v217_v37 = vsel %vm216_vm0, %v213_v36, -inf }
 0x13a   :  { %218 = vmax.xlane.f32.xlu0 %v217_v37  ;;  %v360_v37 = vld [vmem:[#allocation8 + $0x20] sm:$0xff] }
 0x1ad   :  { %v219_v38 = vpop.xlane.xlu0 %218 }
 0x1ae   :  { %v220_v39 = vsub.f32 %v213_v36, %v219_v38  ;;  %v361_v36 = vld [vmem:[#allocation8 + $0x28] sm:$0xff]  ;;  %v359_v38 = vld [vmem:[#allocation8 + $0x18] sm:$0xff] }
 0x1af   :  { %386 = vmatpush.msrb.mxu0 %v361_v36  ;;  %v475_v36 = vld [vmem:[#allocation11 + $0x48] sm:$0xff] }
 0x1b0   :  { %v221_v40 = vmul.f32 1.442695, %v220_v39  ;;  %v358_v39 = vld [vmem:[#allocation8 + $0x10] sm:$0xff]  ;;  %492 = vmatpush.msrb.mxu3 %v475_v36 }
 0x1b1   :  { %387 = vmatpush.msrb.mxu0 %v360_v37  ;;  %v474_v37 = vld [vmem:[#allocation11 + $0x40] sm:$0xff] }
 0x1b2   :  { %542 = vpow2.f32 %v221_v40  ;;  %v357_v40 = vld [vmem:[#allocation8 + $0x8] sm:$0xff]  ;;  %493 = vmatpush.msrb.mxu3 %v474_v37 }
 0x1b3   :  { %388 = vmatpush.msrb.mxu0 %v359_v38  ;;  %v473_v38 = vld [vmem:[#allocation11 + $0x38] sm:$0xff] }
 0x1b4   :  { %494 = vmatpush.msrb.mxu3 %v473_v38 }
 0x1b5   :  { %389 = vmatpush.msrb.mxu0 %v358_v39  ;;  %v472_v39 = vld [vmem:[#allocation11 + $0x30] sm:$0xff] }
 0x1b6   :  { %495 = vmatpush.msrb.mxu3 %v472_v39 }
 0x1b7   :  { %390 = vmatpush.msrb.mxu0 %v357_v40  ;;  %v471_v40 = vld [vmem:[#allocation11 + $0x28] sm:$0xff] }
 0x1b8   :  { %v941_v41 = vpop.eup %542  ;;  %496 = vmatpush.msrb.mxu3 %v471_v40 }
 0x1b9   :  { %v223_v42 = vsel %vm216_vm0, %v941_v41, 0.0 }
 0x1ba   :  { %224 = vadd.xlane.f32.xlu0 %v223_v42  ;;  %v538_v42 = vld [vmem:[%s969_s7] ss:$0 sm:$0xff] }
 0x22d   :  { %v225_v58 = vpop.xlane.xlu0 %224 }
 0x22e   :  { %544 = vrcp.f32 %v225_v58  ;;  %v237_v10 = vand.u32 2147483648, %v225_v58  ;;  %v235_v12 = vand.u32 2147483647, %v225_v58  ;;  %vm231_vm2 = vweird.f32 %v225_v58 }
 0x230   :  { %v238_v17 = vor.u32 1.1754944e-38, %v237_v10  ;;  %vm236_vm4 = vcmp.eq.f32.partialorder %v235_v12, 8.507059e+37  ;;  %v413_v10 = vld [vmem:[#allocation10 + $0x10] sm:$0xff]  ;;  %v411_v12 = vld [vmem:[#allocation10] sm:$0xff] }
 0x234   :  { %v545_v3 = vpop.eup %544 }
 0x235   :  { %v227_v4 = vmul.f32 %v545_v3, %v225_v58  ;;  %vm232_vm1 = vweird.f32 %v545_v3 }
 0x236   :  { %vm233_vm3 = vmor %vm231_vm2, %vm232_vm1 }
 0x237   :  { %v228_v7 = vsub.f32 1.0, %v227_v4  ;;  %v419_v4 = vld [vmem:[#allocation10 + $0x40] sm:$0xff] }
 0x239   :  { %v229_v11 = vmul.f32 %v545_v3, %v228_v7  ;;  %v416_v7 = vld [vmem:[#allocation10 + $0x28] sm:$0xff] }
 0x23b   :  { %v230_v15 = vadd.f32 %v545_v3, %v229_v11  ;;  %v412_v11 = vld [vmem:[#allocation10 + $0x8] sm:$0xff] }
 0x23d   :  { %v234_v18 = vsel %vm233_vm3, %v545_v3, %v230_v15  ;;  %v420_v3 = vld [vmem:[#allocation10 + $0x48] sm:$0xff] }
 0x23e   :  { %v239_v19 = vsel %vm236_vm4, %v238_v17, %v234_v18  ;;  %437 = vmatpush.msrb.mxu1 %v420_v3 }
 0x23f   :  { %v240_v20 = vmul.f32 %v941_v41, %v239_v19  ;;  %v356_v41 = vld [vmem:[#allocation8] sm:$0xff] }
 0x240   :  { %391 = vmatpush.msrb.mxu0 %v356_v41  ;;  %438 = vmatpush.msrb.mxu1 %v419_v4  ;;  %v470_v41 = vld [vmem:[#allocation11 + $0x20] sm:$0xff] }
 0x241   :  { %527 = vmatmul.msk.f32.vlgmr.msra.gmra.mxu2 %vm216_vm0, %v240_v20  ;;  %497 = vmatpush.msrb.mxu3 %v470_v41 }
 0x242   :  { %439 = vmatpush.msrb.mxu1 %v418_v5 }
 0x244   :  { %440 = vmatpush.msrb.mxu1 %v417_v6 }
 0x246   :  { %441 = vmatpush.msrb.mxu1 %v416_v7 }
 0x248   :  { %442 = vmatpush.msrb.mxu1 %v415_v8 }
 0x249   :  { %337 = vmatmul.f32.vlgmr.msrb.gmra.mxu2 %v139_v24 }
 0x24a   :  { %443 = vmatpush.msrb.mxu1 %v414_v9 }
 0x24c   :  { %444 = vmatpush.msrb.mxu1 %v413_v10 }
 0x24e   :  { %445 = vmatpush.msrb.mxu1 %v412_v11 }
 0x250   :  { %446 = vmatpush.msrb.mxu1 %v411_v12 }
 0x2c4   :  { %v262_v25 = vpop.f32.mrf.mxu2 }
 0x2c5   :  { %317 = vmatmul.f32.vlgmr.msra.gmra.mxu3 %v262_v25 }
 0x2cc   :  { %v338_v44 = vpop.f32.mrf.mxu2 }
 0x348   :  { %v318_v43 = vpop.f32.mrf.mxu3 }
 0x349   :  { %v319_v46 = vadd.f32 %v538_v42, %v318_v43  ;;  %v469_v42 = vld [vmem:[#allocation11 + $0x18] sm:$0xff]  ;;  %v468_v43 = vld [vmem:[#allocation11 + $0x10] sm:$0xff] }
 0x34a   :  { %498 = vmatpush.msrb.mxu3 %v469_v42 }
 0x34b   :  { %v339_v47 = vadd.f32 %v338_v44, %v319_v46  ;;  %v467_v44 = vld [vmem:[#allocation11 + $0x8] sm:$0xff]  ;;  %v540_v46 = vld [vmem:[%s973_s11] ss:$0 sm:$0xff] }
 0x34c   :  { %499 = vmatpush.msrb.mxu3 %v468_v43 }
 0x34d   :  { %v342_v48 = vand.u32 2147483647, %v339_v47  ;;  %v341_v59 = vmax.f32 %v339_v47, 0.0 }
 0x34e   :  { %500 = vmatpush.msrb.mxu3 %v467_v44 }
 0x34f   :  { %v343_v49 = vsub.f32 0.0, %v342_v48 }
 0x350   :  { %501 = vmatpush.msrb.mxu3 %v466_v45 }
 0x351   :  { %v344_v50 = vmul.f32 1.442695, %v343_v49 }
 0x353   :  { %546 = vpow2.f32 %v344_v50 }
 0x359   :  { %v547_v51 = vpop.eup %546 }
 0x35a   :  { %v346_v52 = vadd.f32 1.0, %v547_v51  ;;  %v349_v53 = vmul.f32 -0.5, %v547_v51  ;;  %v352_v55 = vand.u32 2147483647, %v547_v51 }
 0x35c   :  { %548 = vlog2.f32 %v346_v52  ;;  %v350_v54 = vadd.f32 1.0, %v349_v53  ;;  %vm353_vm5 = vcmp.lt.f32.partialorder %v352_v55, 0.0004427343 }
 0x35e   :  { %v351_v58 = vmul.f32 %v547_v51, %v350_v54 }
 0x362   :  { %v549_v56 = vpop.eup %548 }
 0x363   :  { %v348_v57 = vmul.f32 0.6931472, %v549_v56 }
 0x365   :  { %v354_v60 = vsel %vm353_vm5, %v351_v58, %v348_v57 }
 0x366   :  { %v355_v61 = vadd.f32 %v354_v60, %v341_v59 }
 0x368   :  { %392 = vmatmul.f32.vlgmr.msrb.gmra.mxu0 %v355_v61 }
 0x3e5   :  { %v393_v15 = vpop.f32.mrf.mxu0 }
 0x3e6   :  { %v394_v16 = vadd.f32 %v539_v13, %v393_v15 }
 0x3e8   :  { %v397_v17 = vand.u32 2147483647, %v394_v16  ;;  %v396_v28 = vmax.f32 %v394_v16, 0.0 }
 0x3ea   :  { %v398_v18 = vsub.f32 0.0, %v397_v17 }
 0x3ec   :  { %v399_v19 = vmul.f32 1.442695, %v398_v18 }
 0x3ee   :  { %550 = vpow2.f32 %v399_v19 }
 0x3f4   :  { %v551_v20 = vpop.eup %550 }
 0x3f5   :  { %v401_v21 = vadd.f32 1.0, %v551_v20  ;;  %v404_v22 = vmul.f32 -0.5, %v551_v20  ;;  %v407_v24 = vand.u32 2147483647, %v551_v20 }
 0x3f7   :  { %552 = vlog2.f32 %v401_v21  ;;  %v405_v23 = vadd.f32 1.0, %v404_v22  ;;  %vm408_vm6 = vcmp.lt.f32.partialorder %v407_v24, 0.0004427343 }
 0x3f9   :  { %v406_v27 = vmul.f32 %v551_v20, %v405_v23 }
 0x3fd   :  { %v553_v25 = vpop.eup %552 }
 0x3fe   :  { %v403_v26 = vmul.f32 0.6931472, %v553_v25 }
 0x400   :  { %v409_v29 = vsel %vm408_vm6, %v406_v27, %v403_v26 }
 0x401   :  { %v410_v30 = vadd.f32 %v409_v29, %v396_v28 }
 0x403   :  { %447 = vmatmul.f32.vlgmr.msrb.gmra.mxu1 %v410_v30 }
 0x480   :  { %v448_v47 = vpop.f32.mrf.mxu1 }
 0x481   :  { %v449_v48 = vadd.f32 %v540_v46, %v448_v47 }
 0x483   :  { %v452_v49 = vand.u32 2147483647, %v449_v48  ;;  %v451_v60 = vmax.f32 %v449_v48, 0.0 }
 0x485   :  { %v453_v50 = vsub.f32 0.0, %v452_v49 }
 0x487   :  { %v454_v51 = vmul.f32 1.442695, %v453_v50 }
 0x489   :  { %554 = vpow2.f32 %v454_v51 }
 0x48f   :  { %v555_v52 = vpop.eup %554 }
 0x490   :  { %v456_v53 = vadd.f32 1.0, %v555_v52  ;;  %v459_v54 = vmul.f32 -0.5, %v555_v52  ;;  %v462_v56 = vand.u32 2147483647, %v555_v52 }
 0x492   :  { %556 = vlog2.f32 %v456_v53  ;;  %v460_v55 = vadd.f32 1.0, %v459_v54  ;;  %vm463_vm7 = vcmp.lt.f32.partialorder %v462_v56, 0.0004427343 }
 0x494   :  { %v461_v59 = vmul.f32 %v555_v52, %v460_v55 }
 0x498   :  { %v557_v57 = vpop.eup %556 }
 0x499   :  { %v458_v58 = vmul.f32 0.6931472, %v557_v57 }
 0x49b   :  { %v464_v61 = vsel %vm463_vm7, %v461_v59, %v458_v58 }
 0x49c   :  { %v465_v62 = vadd.f32 %v464_v61, %v451_v60 }
 0x49e   :  { %502 = vmatmul.f32.vlgmr.msrb.gmra.mxu3 %v465_v62 }
 0x521   :  { %v503_v0 = vpop.f32.mrf.mxu3 }
 0x522   :  { %v504_v1 = vadd.f32 %v541_v63, %v503_v0 }
 0x524   :  { %506 = vst [vmem:[#allocation13] sm:$0xff] %v504_v1 }
 0x525   :  { %517 = dma.vmem_to_hbm [thread:$0]  %s513_s28, 128, %s515_s26, [#allocation4]  }
 0x526   :  { %734 = dma.done.wait [#allocation4], 128  }
 0x527   :  { %735 = vsyncadd [#allocation4], 4294967168 }
 0x528   :  { %522 = vsyncpa [#allocation3], 1 }
 0x529   :  { %523 = vsyncpa [#allocation6], 1 }
 0x52a   :  { %524 = vsyncpa [#allocation9], 1 }
 0x52b   :  { %525 = vsyncpa [#allocation12], 1 }
 0x52c   :  { %526 = vsyncpa [#allocation4], 1 }

// kernel: tpu_custom_call.1
= control target key start
LH: loop header
LB: loop body
LE: loop exit
PB: predicated region body
PF: predicated region fallthrough
CT: control target
= control target key end

     0   :  { %19 = vsyncpa [#allocation3], 0  ;;  %s962_s0 = inlined_call_operand.vmem [shape: f32[8,128], index: 0, kind: input, shape index: {}]   ;;  %s963_s1 = inlined_call_operand.hbm [shape: f32[8,128], index: 1, kind: input, shape index: {}]   ;;  %s964_s2 = inlined_call_operand.vmem [shape: f32[128,8], index: 2, kind: input, shape index: {}]   ;;  %s965_s3 = inlined_call_operand.hbm [shape: f32[8,128], index: 3, kind: input, shape index: {}]   ;;  %s966_s4 = inlined_call_operand.vmem [shape: f32[128,128], index: 4, kind: input, shape index: {}]   ;;  %s967_s5 = inlined_call_operand.vmem [shape: f32[1,128], index: 5, kind: input, shape index: {}]   ;;  %s968_s6 = inlined_call_operand.hbm [shape: f32[256,128], index: 6, kind: input, shape index: {}]   ;;  %s969_s7 = inlined_call_operand.vmem [shape: f32[1,128], index: 7, kind: input, shape index: {}]   ;;  %s970_s8 = inlined_call_operand.hbm [shape: f32[128,128], index: 8, kind: input, shape index: {}]   ;;  %s971_s9 = inlined_call_operand.vmem [shape: f32[1,128], index: 9, kind: input, shape index: {}]   ;;  %s972_s10 = inlined_call_operand.hbm [shape: f32[128,128], index: 10, kind: input, shape index: {}]   ;;  %s973_s11 = inlined_call_operand.vmem [shape: f32[1,128], index: 11, kind: input, shape index: {}]   ;;  %s974_s12 = inlined_call_operand.hbm [shape: f32[128,128], index: 12, kind: input, shape index: {}]   ;;  %s975_s13 = inlined_call_operand.vmem [shape: f32[1,128], index: 13, kind: input, shape index: {}]   ;;  %s976_s14 = inlined_call_operand.hbm [shape: f32[8,128], index: 14, kind: output, shape index: {}]  }
   0x1   :  { %20 = vsyncpa [#allocation6], 0 }
   0x2   :  { %21 = vsyncpa [#allocation9], 0 }
   0x3   :  { %22 = vsyncpa [#allocation12], 0  ;;  %s44_s15 = sshll.u32 %s965_s3, 4  ;;  %s45_s15 = int_to_ptr.hbm [resolvable:$true] %s44_s15 }
   0x4   :  { %23 = vsyncpa [#allocation4], 0  ;;  %s736_s16 = smov [#allocation5]   ;;  %s73_s20 = sshll.u32 %s970_s8, 4  ;;  %s74_s20 = int_to_ptr.hbm [resolvable:$true] %s73_s20 }
   0x5   :  { %s46_s17 = sshll.u32 %s736_s16, 4  ;;  %s737_s21 = smov [#allocation8]   ;;  %s47_s17 = int_to_ptr.vmem [resolvable:$true] %s46_s17 }
   0x6   :  { %49 = dma.hbm_to_vmem [thread:$0]  %s45_s15, 128, %s47_s17, [#allocation6]  }
   0x7   :  { %s75_s22 = sshll.u32 %s737_s21, 4  ;;  %s31_s25 = sshll.u32 %s963_s1, 4  ;;  %s76_s22 = int_to_ptr.vmem [resolvable:$true] %s75_s22  ;;  %s32_s25 = int_to_ptr.hbm [resolvable:$true] %s31_s25 }
   0x8   :  { %s738_s3 = smov 128   ;;  %s739_s26 = smov 8  }
   0x9   :  { %81 = dma.hbm_to_vmem [thread:$0]  %s74_s20, 2048, %s76_s22, [#allocation9], %s738_s3, %s738_s3, %s739_s26  }
   0xa   :  { %s58_s29 = sshll.u32 %s968_s6, 4  ;;  %s740_s30 = smov [#allocation2]   ;;  %s59_s29 = int_to_ptr.hbm [resolvable:$true] %s58_s29 }
   0xb   :  { %s33_s15 = sshll.u32 %s740_s30, 4  ;;  %s741_s8 = smov [#allocation7]   ;;  %s34_s15 = int_to_ptr.vmem [resolvable:$true] %s33_s15 }
   0xc   :  { %36 = dma.hbm_to_vmem [thread:$0]  %s32_s25, 128, %s34_s15, [#allocation3]  }
   0xd   :  { %s60_s16 = sshll.u32 %s741_s8, 4  ;;  %s88_s1 = sshll.u32 %s972_s10, 4  ;;  %s61_s16 = int_to_ptr.vmem [resolvable:$true] %s60_s16  ;;  %s89_s1 = int_to_ptr.hbm [resolvable:$true] %s88_s1 }
   0xe   :  { %66 = dma.hbm_to_vmem [thread:$0]  %s59_s29, 4096, %s61_s16, [#allocation6], %s738_s3, %s738_s3, %s739_s26  }
   0xf   :  { %s103_s21 = sshll.u32 %s974_s12, 4  ;;  %s742_s22 = smov [#allocation10]   ;;  %s104_s21 = int_to_ptr.hbm [resolvable:$true] %s103_s21 }
  0x10   :  { %s90_s6 = sshll.u32 %s742_s22, 4  ;;  %s743_s23 = smov [#allocation11]   ;;  %s91_s6 = int_to_ptr.vmem [resolvable:$true] %s90_s6 }
  0x11   :  { %96 = dma.hbm_to_vmem [thread:$0]  %s89_s1, 2048, %s91_s6, [#allocation9], %s738_s3, %s738_s3, %s739_s26  }
  0x12   :  { %s105_s24 = sshll.u32 %s743_s23, 4  ;;  %s106_s24 = int_to_ptr.vmem [resolvable:$true] %s105_s24 }
  0x13   :  { %111 = dma.hbm_to_vmem [thread:$0]  %s104_s21, 2048, %s106_s24, [#allocation12], %s738_s3, %s738_s3, %s739_s26  }
  0x14   :  { %726 = dma.done.wait [#allocation3], 128  }
  0x15   :  { %727 = vsyncadd [#allocation3], 4294967168 }
  0x16   :  { %728 = dma.done.wait [#allocation6], 4224  }
  0x17   :  { %729 = vsyncadd [#allocation6], 4294963072 }
  0x18   :  { %730 = dma.done.wait [#allocation9], 4096  }
  0x19   :  { %731 = vsyncadd [#allocation9], 4294963200 }
  0x1a   :  { %732 = dma.done.wait [#allocation12], 2048  }
  0x1b   :  { %733 = vsyncadd [#allocation12], 4294965248  ;;  %v155_v0 = vld [vmem:[%s966_s4 + $0x78] sm:$0xff]  ;;  %v154_v1 = vld [vmem:[%s966_s4 + $0x70] sm:$0xff]  ;;  %vm216_vm0 = vcmask 64512   ;;  %s744_s27 = smov [#allocation13]  }
  0x1c   :  { %160 = vmatpush.msra.mxu0 %v155_v0  ;;  %v153_v2 = vld [vmem:[%s966_s4 + $0x68] sm:$0xff]  ;;  %v152_v3 = vld [vmem:[%s966_s4 + $0x60] sm:$0xff]  ;;  %v195_v4 = vld [vmem:[%s964_s2 + $0x78] sm:$0xff]  ;;  %s512_s28 = sshll.u32 %s744_s27, 4  ;;  %s514_s26 = sshll.u32 %s976_s14, 4  ;;  %s513_s28 = int_to_ptr.vmem [resolvable:$true] %s512_s28  ;;  %s515_s26 = int_to_ptr.hbm [resolvable:$true] %s514_s26 }
  0x1d   :  { %v151_v5 = vld [vmem:[%s966_s4 + $0x58] sm:$0xff]  ;;  %196 = vmatpush.msra.mxu1 %v195_v4  ;;  %v194_v6 = vld [vmem:[%s964_s2 + $0x70] sm:$0xff]  ;;  %v193_v7 = vld [vmem:[%s964_s2 + $0x68] sm:$0xff] }
  0x1e   :  { %161 = vmatpush.msra.mxu0 %v154_v1  ;;  %v150_v8 = vld [vmem:[%s966_s4 + $0x50] sm:$0xff]  ;;  %v192_v9 = vld [vmem:[%s964_s2 + $0x60] sm:$0xff]  ;;  %v149_v10 = vld [vmem:[%s966_s4 + $0x48] sm:$0xff] }
  0x1f   :  { %197 = vmatpush.msra.mxu1 %v194_v6  ;;  %v191_v11 = vld [vmem:[%s964_s2 + $0x58] sm:$0xff]  ;;  %v148_v12 = vld [vmem:[%s966_s4 + $0x40] sm:$0xff]  ;;  %v190_v13 = vld [vmem:[%s964_s2 + $0x50] sm:$0xff] }
  0x20   :  { %162 = vmatpush.msra.mxu0 %v153_v2  ;;  %v147_v14 = vld [vmem:[%s966_s4 + $0x38] sm:$0xff]  ;;  %v189_v15 = vld [vmem:[%s964_s2 + $0x48] sm:$0xff]  ;;  %v146_v16 = vld [vmem:[%s966_s4 + $0x30] sm:$0xff] }
  0x21   :  { %198 = vmatpush.msra.mxu1 %v193_v7  ;;  %v188_v17 = vld [vmem:[%s964_s2 + $0x40] sm:$0xff]  ;;  %v145_v18 = vld [vmem:[%s966_s4 + $0x28] sm:$0xff]  ;;  %v187_v19 = vld [vmem:[%s964_s2 + $0x38] sm:$0xff] }
  0x22   :  { %163 = vmatpush.msra.mxu0 %v152_v3  ;;  %v144_v20 = vld [vmem:[%s966_s4 + $0x20] sm:$0xff]  ;;  %v186_v21 = vld [vmem:[%s964_s2 + $0x30] sm:$0xff]  ;;  %v143_v22 = vld [vmem:[%s966_s4 + $0x18] sm:$0xff] }
  0x23   :  { %199 = vmatpush.msra.mxu1 %v192_v9  ;;  %v185_v23 = vld [vmem:[%s964_s2 + $0x28] sm:$0xff]  ;;  %v142_v24 = vld [vmem:[%s966_s4 + $0x10] sm:$0xff]  ;;  %v184_v25 = vld [vmem:[%s964_s2 + $0x20] sm:$0xff] }
  0x24   :  { %164 = vmatpush.msra.mxu0 %v151_v5  ;;  %v141_v26 = vld [vmem:[%s966_s4 + $0x8] sm:$0xff]  ;;  %v183_v27 = vld [vmem:[%s964_s2 + $0x18] sm:$0xff]  ;;  %v140_v28 = vld [vmem:[%s966_s4] sm:$0xff] }
  0x25   :  { %200 = vmatpush.msra.mxu1 %v191_v11  ;;  %v138_v29 = vld [vmem:[%s962_s0] sm:$0xff]  ;;  %v182_v30 = vld [vmem:[%s964_s2 + $0x10] sm:$0xff]  ;;  %v181_v31 = vld [vmem:[%s964_s2 + $0x8] sm:$0xff] }
  0x26   :  { %165 = vmatpush.msra.mxu0 %v150_v8  ;;  %v180_v32 = vld [vmem:[%s964_s2] sm:$0xff]  ;;  %v241_v43 = vld [vmem:[#allocation5] sm:$0xff]  ;;  %v278_v48 = vld [vmem:[#allocation7 + $0x68] sm:$0xff] }
  0x27   :  { %201 = vmatpush.msra.mxu1 %v190_v13  ;;  %v537_v33 = vld [vmem:[%s967_s5] ss:$0 sm:$0xff]  ;;  %260 = vmatpush.msra.mxu2 %v241_v43  ;;  %v280_v44 = vld [vmem:[#allocation7 + $0x78] sm:$0xff]  ;;  %v294_v49 = vld [vmem:[#allocation7 + $0xe8] sm:$0xff] }
  0x28   :  { %166 = vmatpush.msra.mxu0 %v149_v10  ;;  %v279_v45 = vld [vmem:[#allocation7 + $0x70] sm:$0xff]  ;;  %v296_v46 = vld [vmem:[#allocation7 + $0xf8] sm:$0xff]  ;;  %301 = vmatpush.msra.mxu3 %v280_v44  ;;  %v277_v50 = vld [vmem:[#allocation7 + $0x60] sm:$0xff] }
  0x29   :  { %202 = vmatpush.msra.mxu1 %v189_v15  ;;  %321 = vmatpush.msrb.mxu2 %v296_v46  ;;  %v295_v47 = vld [vmem:[#allocation7 + $0xf0] sm:$0xff]  ;;  %v293_v51 = vld [vmem:[#allocation7 + $0xe0] sm:$0xff]  ;;  %v276_v52 = vld [vmem:[#allocation7 + $0x58] sm:$0xff] }
  0x2a   :  { %167 = vmatpush.msra.mxu0 %v148_v12  ;;  %302 = vmatpush.msra.mxu3 %v279_v45  ;;  %v292_v53 = vld [vmem:[#allocation7 + $0xd8] sm:$0xff]  ;;  %v275_v54 = vld [vmem:[#allocation7 + $0x50] sm:$0xff]  ;;  %v274_v56 = vld [vmem:[#allocation7 + $0x48] sm:$0xff] }
  0x2b   :  { %203 = vmatpush.msra.mxu1 %v188_v17  ;;  %322 = vmatpush.msrb.mxu2 %v295_v47  ;;  %v291_v55 = vld [vmem:[#allocation7 + $0xd0] sm:$0xff]  ;;  %v290_v57 = vld [vmem:[#allocation7 + $0xc8] sm:$0xff]  ;;  %v273_v59 = vld [vmem:[#allocation7 + $0x40] sm:$0xff] }
  0x2c   :  { %168 = vmatpush.msra.mxu0 %v147_v14  ;;  %303 = vmatpush.msra.mxu3 %v278_v48  ;;  %v289_v60 = vld [vmem:[#allocation7 + $0xc0] sm:$0xff]  ;;  %v272_v61 = vld [vmem:[#allocation7 + $0x38] sm:$0xff]  ;;  %v271_v63 = vld [vmem:[#allocation7 + $0x30] sm:$0xff] }
  0x2d   :  { %204 = vmatpush.msra.mxu1 %v187_v19  ;;  %323 = vmatpush.msrb.mxu2 %v294_v49  ;;  %v288_v62 = vld [vmem:[#allocation7 + $0xb8] sm:$0xff]  ;;  %v287_v0 = vld [vmem:[#allocation7 + $0xb0] sm:$0xff]  ;;  %v270_v1 = vld [vmem:[#allocation7 + $0x28] sm:$0xff] }
  0x2e   :  { %169 = vmatpush.msra.mxu0 %v146_v16  ;;  %304 = vmatpush.msra.mxu3 %v277_v50  ;;  %v286_v2 = vld [vmem:[#allocation7 + $0xa8] sm:$0xff]  ;;  %v269_v5 = vld [vmem:[#allocation7 + $0x20] sm:$0xff]  ;;  %v268_v8 = vld [vmem:[#allocation7 + $0x18] sm:$0xff] }
  0x2f   :  { %205 = vmatpush.msra.mxu1 %v186_v21  ;;  %324 = vmatpush.msrb.mxu2 %v293_v51  ;;  %v285_v6 = vld [vmem:[#allocation7 + $0xa0] sm:$0xff]  ;;  %v284_v9 = vld [vmem:[#allocation7 + $0x98] sm:$0xff]  ;;  %v267_v13 = vld [vmem:[#allocation7 + $0x10] sm:$0xff] }
  0x30   :  { %170 = vmatpush.msra.mxu0 %v145_v18  ;;  %305 = vmatpush.msra.mxu3 %v276_v52  ;;  %v283_v14 = vld [vmem:[#allocation7 + $0x90] sm:$0xff]  ;;  %v266_v16 = vld [vmem:[#allocation7 + $0x8] sm:$0xff]  ;;  %v265_v21 = vld [vmem:[#allocation7] sm:$0xff] }
  0x31   :  { %206 = vmatpush.msra.mxu1 %v185_v23  ;;  %325 = vmatpush.msrb.mxu2 %v292_v53  ;;  %v281_v23 = vld [vmem:[#allocation7 + $0x80] sm:$0xff]  ;;  %v426_v45 = vld [vmem:[#allocation10 + $0x78] sm:$0xff] }
  0x32   :  { %171 = vmatpush.msra.mxu0 %v144_v20  ;;  %306 = vmatpush.msra.mxu3 %v275_v54 }
  0x33   :  { %207 = vmatpush.msra.mxu1 %v184_v25  ;;  %326 = vmatpush.msrb.mxu2 %v291_v55 }
  0x34   :  { %172 = vmatpush.msra.mxu0 %v143_v22  ;;  %307 = vmatpush.msra.mxu3 %v274_v56  ;;  %v282_v22 = vld [vmem:[#allocation7 + $0x88] sm:$0xff] }
  0x35   :  { %208 = vmatpush.msra.mxu1 %v183_v27  ;;  %327 = vmatpush.msrb.mxu2 %v290_v57  ;;  %v370_v27 = vld [vmem:[#allocation8 + $0x70] sm:$0xff] }
  0x36   :  { %173 = vmatpush.msra.mxu0 %v142_v24  ;;  %308 = vmatpush.msra.mxu3 %v273_v59  ;;  %v139_v24 = vld [vmem:[#allocation2] sm:$0xff] }
  0x37   :  { %209 = vmatpush.msra.mxu1 %v182_v30  ;;  %328 = vmatpush.msrb.mxu2 %v289_v60  ;;  %v367_v30 = vld [vmem:[#allocation8 + $0x58] sm:$0xff] }
  0x38   :  { %174 = vmatpush.msra.mxu0 %v141_v26  ;;  %309 = vmatpush.msra.mxu3 %v272_v61  ;;  %v371_v26 = vld [vmem:[#allocation8 + $0x78] sm:$0xff] }
  0x39   :  { %210 = vmatpush.msra.mxu1 %v181_v31  ;;  %329 = vmatpush.msrb.mxu2 %v288_v62  ;;  %v366_v31 = vld [vmem:[#allocation8 + $0x50] sm:$0xff] }
  0x3a   :  { %175 = vmatpush.msra.mxu0 %v140_v28  ;;  %310 = vmatpush.msra.mxu3 %v271_v63  ;;  %v369_v28 = vld [vmem:[#allocation8 + $0x68] sm:$0xff]  ;;  %v425_v62 = vld [vmem:[#allocation10 + $0x70] sm:$0xff] }
  0x3b   :  { %176 = vmatmul.f32.vlgmr.msra.gmra.mxu0 %v138_v29  ;;  %211 = vmatpush.msra.mxu1 %v180_v32  ;;  %v368_v29 = vld [vmem:[#allocation8 + $0x60] sm:$0xff]  ;;  %v365_v32 = vld [vmem:[#allocation8 + $0x48] sm:$0xff] }
  0x3c   :  { %330 = vmatpush.msrb.mxu2 %v287_v0  ;;  %311 = vmatpush.msra.mxu3 %v270_v1  ;;  %v424_v63 = vld [vmem:[#allocation10 + $0x68] sm:$0xff]  ;;  %v423_v0 = vld [vmem:[#allocation10 + $0x60] sm:$0xff]  ;;  %v422_v1 = vld [vmem:[#allocation10 + $0x58] sm:$0xff] }
  0x3d   :  { %376 = vmatpush.msrb.mxu0 %v371_v26  ;;  %431 = vmatpush.msrb.mxu1 %v426_v45  ;;  %v466_v45 = vld [vmem:[#allocation11] sm:$0xff] }
  0x3e   :  { %331 = vmatpush.msrb.mxu2 %v286_v2  ;;  %312 = vmatpush.msra.mxu3 %v269_v5  ;;  %v421_v2 = vld [vmem:[#allocation10 + $0x50] sm:$0xff]  ;;  %v418_v5 = vld [vmem:[#allocation10 + $0x38] sm:$0xff] }
  0x3f   :  { %377 = vmatpush.msrb.mxu0 %v370_v27  ;;  %432 = vmatpush.msrb.mxu1 %v425_v62 }
  0x40   :  { %332 = vmatpush.msrb.mxu2 %v285_v6  ;;  %313 = vmatpush.msra.mxu3 %v268_v8  ;;  %v417_v6 = vld [vmem:[#allocation10 + $0x30] sm:$0xff]  ;;  %v415_v8 = vld [vmem:[#allocation10 + $0x20] sm:$0xff] }
  0x41   :  { %378 = vmatpush.msrb.mxu0 %v369_v28  ;;  %433 = vmatpush.msrb.mxu1 %v424_v63  ;;  %v541_v63 = vld [vmem:[%s975_s13] ss:$0 sm:$0xff] }
  0x42   :  { %333 = vmatpush.msrb.mxu2 %v284_v9  ;;  %314 = vmatpush.msra.mxu3 %v267_v13  ;;  %v414_v9 = vld [vmem:[#allocation10 + $0x18] sm:$0xff]  ;;  %v539_v13 = vld [vmem:[%s971_s9] ss:$0 sm:$0xff] }
  0x43   :  { %379 = vmatpush.msrb.mxu0 %v368_v29  ;;  %434 = vmatpush.msrb.mxu1 %v423_v0 }
  0x44   :  { %334 = vmatpush.msrb.mxu2 %v283_v14  ;;  %315 = vmatpush.msra.mxu3 %v266_v16  ;;  %v481_v14 = vld [vmem:[#allocation11 + $0x78] sm:$0xff] }
  0x45   :  { %380 = vmatpush.msrb.mxu0 %v367_v30  ;;  %435 = vmatpush.msrb.mxu1 %v422_v1 }
  0x46   :  { %316 = vmatpush.msra.mxu3 %v265_v21  ;;  %335 = vmatpush.msrb.mxu2 %v282_v22 }
  0x47   :  { %381 = vmatpush.msrb.mxu0 %v366_v31  ;;  %436 = vmatpush.msrb.mxu1 %v421_v2  ;;  %v480_v31 = vld [vmem:[#allocation11 + $0x70] sm:$0xff] }
  0x48   :  { %336 = vmatpush.msrb.mxu2 %v281_v23  ;;  %486 = vmatpush.msrb.mxu3 %v481_v14 }
  0x49   :  { %382 = vmatpush.msrb.mxu0 %v365_v32  ;;  %v479_v32 = vld [vmem:[#allocation11 + $0x68] sm:$0xff] }
  0x4a   :  { %487 = vmatpush.msrb.mxu3 %v480_v31 }
  0x4c   :  { %488 = vmatpush.msrb.mxu3 %v479_v32 }
  0xb8   :  { %v177_v34 = vpop.f32.mrf.mxu0 }
  0xb9   :  { %v178_v35 = vadd.f32 %v537_v33, %v177_v34  ;;  %v364_v33 = vld [vmem:[#allocation8 + $0x40] sm:$0xff]  ;;  %v363_v34 = vld [vmem:[#allocation8 + $0x38] sm:$0xff] }
  0xba   :  { %383 = vmatpush.msrb.mxu0 %v364_v33  ;;  %v478_v33 = vld [vmem:[#allocation11 + $0x60] sm:$0xff] }
  0xbb   :  { %212 = vmatmul.f32.vlgmr.msra.gmra.mxu1 %v178_v35  ;;  %v362_v35 = vld [vmem:[#allocation8 + $0x30] sm:$0xff]  ;;  %489 = vmatpush.msrb.mxu3 %v478_v33 }
  0xbc   :  { %384 = vmatpush.msrb.mxu0 %v363_v34  ;;  %v477_v34 = vld [vmem:[#allocation11 + $0x58] sm:$0xff] }
  0xbd   :  { %490 = vmatpush.msrb.mxu3 %v477_v34 }
  0xbe   :  { %385 = vmatpush.msrb.mxu0 %v362_v35  ;;  %v476_v35 = vld [vmem:[#allocation11 + $0x50] sm:$0xff] }
  0xbf   :  { %491 = vmatpush.msrb.mxu3 %v476_v35 }
 0x138   :  { %v213_v36 = vpop.f32.mrf.mxu1 }
 0x139   :  { %v217_v37 = vsel %vm216_vm0, %v213_v36, -inf }
 0x13a   :  { %218 = vmax.xlane.f32.xlu0 %v217_v37  ;;  %v360_v37 = vld [vmem:[#allocation8 + $0x20] sm:$0xff] }
 0x1ad   :  { %v219_v38 = vpop.xlane.xlu0 %218 }
 0x1ae   :  { %v220_v39 = vsub.f32 %v213_v36, %v219_v38  ;;  %v361_v36 = vld [vmem:[#allocation8 + $0x28] sm:$0xff]  ;;  %v359_v38 = vld [vmem:[#allocation8 + $0x18] sm:$0xff] }
 0x1af   :  { %386 = vmatpush.msrb.mxu0 %v361_v36  ;;  %v475_v36 = vld [vmem:[#allocation11 + $0x48] sm:$0xff] }
 0x1b0   :  { %v221_v40 = vmul.f32 1.442695, %v220_v39  ;;  %v358_v39 = vld [vmem:[#allocation8 + $0x10] sm:$0xff]  ;;  %492 = vmatpush.msrb.mxu3 %v475_v36 }
 0x1b1   :  { %387 = vmatpush.msrb.mxu0 %v360_v37  ;;  %v474_v37 = vld [vmem:[#allocation11 + $0x40] sm:$0xff] }
 0x1b2   :  { %542 = vpow2.f32 %v221_v40  ;;  %v357_v40 = vld [vmem:[#allocation8 + $0x8] sm:$0xff]  ;;  %493 = vmatpush.msrb.mxu3 %v474_v37 }
 0x1b3   :  { %388 = vmatpush.msrb.mxu0 %v359_v38  ;;  %v473_v38 = vld [vmem:[#allocation11 + $0x38] sm:$0xff] }
 0x1b4   :  { %494 = vmatpush.msrb.mxu3 %v473_v38 }
 0x1b5   :  { %389 = vmatpush.msrb.mxu0 %v358_v39  ;;  %v472_v39 = vld [vmem:[#allocation11 + $0x30] sm:$0xff] }
 0x1b6   :  { %495 = vmatpush.msrb.mxu3 %v472_v39 }
 0x1b7   :  { %390 = vmatpush.msrb.mxu0 %v357_v40  ;;  %v471_v40 = vld [vmem:[#allocation11 + $0x28] sm:$0xff] }
 0x1b8   :  { %v941_v41 = vpop.eup %542  ;;  %496 = vmatpush.msrb.mxu3 %v471_v40 }
 0x1b9   :  { %v223_v42 = vsel %vm216_vm0, %v941_v41, 0.0 }
 0x1ba   :  { %224 = vadd.xlane.f32.xlu0 %v223_v42  ;;  %v538_v42 = vld [vmem:[%s969_s7] ss:$0 sm:$0xff] }
 0x22d   :  { %v225_v58 = vpop.xlane.xlu0 %224 }
 0x22e   :  { %544 = vrcp.f32 %v225_v58  ;;  %v237_v10 = vand.u32 2147483648, %v225_v58  ;;  %v235_v12 = vand.u32 2147483647, %v225_v58  ;;  %vm231_vm2 = vweird.f32 %v225_v58 }
 0x230   :  { %v238_v17 = vor.u32 1.1754944e-38, %v237_v10  ;;  %vm236_vm4 = vcmp.eq.f32.partialorder %v235_v12, 8.507059e+37  ;;  %v413_v10 = vld [vmem:[#allocation10 + $0x10] sm:$0xff]  ;;  %v411_v12 = vld [vmem:[#allocation10] sm:$0xff] }
 0x234   :  { %v545_v3 = vpop.eup %544 }
 0x235   :  { %v227_v4 = vmul.f32 %v545_v3, %v225_v58  ;;  %vm232_vm1 = vweird.f32 %v545_v3 }
 0x236   :  { %vm233_vm3 = vmor %vm231_vm2, %vm232_vm1 }
 0x237   :  { %v228_v7 = vsub.f32 1.0, %v227_v4  ;;  %v419_v4 = vld [vmem:[#allocation10 + $0x40] sm:$0xff] }
 0x239   :  { %v229_v11 = vmul.f32 %v545_v3, %v228_v7  ;;  %v416_v7 = vld [vmem:[#allocation10 + $0x28] sm:$0xff] }
 0x23b   :  { %v230_v15 = vadd.f32 %v545_v3, %v229_v11  ;;  %v412_v11 = vld [vmem:[#allocation10 + $0x8] sm:$0xff] }
 0x23d   :  { %v234_v18 = vsel %vm233_vm3, %v545_v3, %v230_v15  ;;  %v420_v3 = vld [vmem:[#allocation10 + $0x48] sm:$0xff] }
 0x23e   :  { %v239_v19 = vsel %vm236_vm4, %v238_v17, %v234_v18  ;;  %437 = vmatpush.msrb.mxu1 %v420_v3 }
 0x23f   :  { %v240_v20 = vmul.f32 %v941_v41, %v239_v19  ;;  %v356_v41 = vld [vmem:[#allocation8] sm:$0xff] }
 0x240   :  { %391 = vmatpush.msrb.mxu0 %v356_v41  ;;  %438 = vmatpush.msrb.mxu1 %v419_v4  ;;  %v470_v41 = vld [vmem:[#allocation11 + $0x20] sm:$0xff] }
 0x241   :  { %527 = vmatmul.msk.f32.vlgmr.msra.gmra.mxu2 %vm216_vm0, %v240_v20  ;;  %497 = vmatpush.msrb.mxu3 %v470_v41 }
 0x242   :  { %439 = vmatpush.msrb.mxu1 %v418_v5 }
 0x244   :  { %440 = vmatpush.msrb.mxu1 %v417_v6 }
 0x246   :  { %441 = vmatpush.msrb.mxu1 %v416_v7 }
 0x248   :  { %442 = vmatpush.msrb.mxu1 %v415_v8 }
 0x249   :  { %337 = vmatmul.f32.vlgmr.msrb.gmra.mxu2 %v139_v24 }
 0x24a   :  { %443 = vmatpush.msrb.mxu1 %v414_v9 }
 0x24c   :  { %444 = vmatpush.msrb.mxu1 %v413_v10 }
 0x24e   :  { %445 = vmatpush.msrb.mxu1 %v412_v11 }
 0x250   :  { %446 = vmatpush.msrb.mxu1 %v411_v12 }
 0x2c4   :  { %v262_v25 = vpop.f32.mrf.mxu2 }
 0x2c5   :  { %317 = vmatmul.f32.vlgmr.msra.gmra.mxu3 %v262_v25 }
 0x2cc   :  { %v338_v44 = vpop.f32.mrf.mxu2 }
 0x348   :  { %v318_v43 = vpop.f32.mrf.mxu3 }
 0x349   :  { %v319_v46 = vadd.f32 %v538_v42, %v318_v43  ;;  %v469_v42 = vld [vmem:[#allocation11 + $0x18] sm:$0xff]  ;;  %v468_v43 = vld [vmem:[#allocation11 + $0x10] sm:$0xff] }
 0x34a   :  { %498 = vmatpush.msrb.mxu3 %v469_v42 }
 0x34b   :  { %v339_v47 = vadd.f32 %v338_v44, %v319_v46  ;;  %v467_v44 = vld [vmem:[#allocation11 + $0x8] sm:$0xff]  ;;  %v540_v46 = vld [vmem:[%s973_s11] ss:$0 sm:$0xff] }
 0x34c   :  { %499 = vmatpush.msrb.mxu3 %v468_v43 }
 0x34d   :  { %v342_v48 = vand.u32 2147483647, %v339_v47  ;;  %v341_v59 = vmax.f32 %v339_v47, 0.0 }
 0x34e   :  { %500 = vmatpush.msrb.mxu3 %v467_v44 }
 0x34f   :  { %v343_v49 = vsub.f32 0.0, %v342_v48 }
 0x350   :  { %501 = vmatpush.msrb.mxu3 %v466_v45 }
 0x351   :  { %v344_v50 = vmul.f32 1.442695, %v343_v49 }
 0x353   :  { %546 = vpow2.f32 %v344_v50 }
 0x359   :  { %v547_v51 = vpop.eup %546 }
 0x35a   :  { %v346_v52 = vadd.f32 1.0, %v547_v51  ;;  %v349_v53 = vmul.f32 -0.5, %v547_v51  ;;  %v352_v55 = vand.u32 2147483647, %v547_v51 }
 0x35c   :  { %548 = vlog2.f32 %v346_v52  ;;  %v350_v54 = vadd.f32 1.0, %v349_v53  ;;  %vm353_vm5 = vcmp.lt.f32.partialorder %v352_v55, 0.0004427343 }
 0x35e   :  { %v351_v58 = vmul.f32 %v547_v51, %v350_v54 }
 0x362   :  { %v549_v56 = vpop.eup %548 }
 0x363   :  { %v348_v57 = vmul.f32 0.6931472, %v549_v56 }
 0x365   :  { %v354_v60 = vsel %vm353_vm5, %v351_v58, %v348_v57 }
 0x366   :  { %v355_v61 = vadd.f32 %v354_v60, %v341_v59 }
 0x368   :  { %392 = vmatmul.f32.vlgmr.msrb.gmra.mxu0 %v355_v61 }
 0x3e5   :  { %v393_v15 = vpop.f32.mrf.mxu0 }
 0x3e6   :  { %v394_v16 = vadd.f32 %v539_v13, %v393_v15 }
 0x3e8   :  { %v397_v17 = vand.u32 2147483647, %v394_v16  ;;  %v396_v28 = vmax.f32 %v394_v16, 0.0 }
 0x3ea   :  { %v398_v18 = vsub.f32 0.0, %v397_v17 }
 0x3ec   :  { %v399_v19 = vmul.f32 1.442695, %v398_v18 }
 0x3ee   :  { %550 = vpow2.f32 %v399_v19 }
 0x3f4   :  { %v551_v20 = vpop.eup %550 }
 0x3f5   :  { %v401_v21 = vadd.f32 1.0, %v551_v20  ;;  %v404_v22 = vmul.f32 -0.5, %v551_v20  ;;  %v407_v24 = vand.u32 2147483647, %v551_v20 }
 0x3f7   :  { %552 = vlog2.f32 %v401_v21  ;;  %v405_v23 = vadd.f32 1.0, %v404_v22  ;;  %vm408_vm6 = vcmp.lt.f32.partialorder %v407_v24, 0.0004427343 }
 0x3f9   :  { %v406_v27 = vmul.f32 %v551_v20, %v405_v23 }
 0x3fd   :  { %v553_v25 = vpop.eup %552 }
 0x3fe   :  { %v403_v26 = vmul.f32 0.6931472, %v553_v25 }
 0x400   :  { %v409_v29 = vsel %vm408_vm6, %v406_v27, %v403_v26 }
 0x401   :  { %v410_v30 = vadd.f32 %v409_v29, %v396_v28 }
 0x403   :  { %447 = vmatmul.f32.vlgmr.msrb.gmra.mxu1 %v410_v30 }
 0x480   :  { %v448_v47 = vpop.f32.mrf.mxu1 }
 0x481   :  { %v449_v48 = vadd.f32 %v540_v46, %v448_v47 }
 0x483   :  { %v452_v49 = vand.u32 2147483647, %v449_v48  ;;  %v451_v60 = vmax.f32 %v449_v48, 0.0 }
 0x485   :  { %v453_v50 = vsub.f32 0.0, %v452_v49 }
 0x487   :  { %v454_v51 = vmul.f32 1.442695, %v453_v50 }
 0x489   :  { %554 = vpow2.f32 %v454_v51 }
 0x48f   :  { %v555_v52 = vpop.eup %554 }
 0x490   :  { %v456_v53 = vadd.f32 1.0, %v555_v52  ;;  %v459_v54 = vmul.f32 -0.5, %v555_v52  ;;  %v462_v56 = vand.u32 2147483647, %v555_v52 }
 0x492   :  { %556 = vlog2.f32 %v456_v53  ;;  %v460_v55 = vadd.f32 1.0, %v459_v54  ;;  %vm463_vm7 = vcmp.lt.f32.partialorder %v462_v56, 0.0004427343 }
 0x494   :  { %v461_v59 = vmul.f32 %v555_v52, %v460_v55 }
 0x498   :  { %v557_v57 = vpop.eup %556 }
 0x499   :  { %v458_v58 = vmul.f32 0.6931472, %v557_v57 }
 0x49b   :  { %v464_v61 = vsel %vm463_vm7, %v461_v59, %v458_v58 }
 0x49c   :  { %v465_v62 = vadd.f32 %v464_v61, %v451_v60 }
 0x49e   :  { %502 = vmatmul.f32.vlgmr.msrb.gmra.mxu3 %v465_v62 }
 0x521   :  { %v503_v0 = vpop.f32.mrf.mxu3 }
 0x522   :  { %v504_v1 = vadd.f32 %v541_v63, %v503_v0 }
 0x524   :  { %506 = vst [vmem:[#allocation13] sm:$0xff] %v504_v1 }
 0x525   :  { %517 = dma.vmem_to_hbm [thread:$0]  %s513_s28, 128, %s515_s26, [#allocation4]  }
 0x526   :  { %734 = dma.done.wait [#allocation4], 128  }
 0x527   :  { %735 = vsyncadd [#allocation4], 4294967168 }
 0x528   :  { %522 = vsyncpa [#allocation3], 1 }
 0x529   :  { %523 = vsyncpa [#allocation6], 1 }
 0x52a   :  { %524 = vsyncpa [#allocation9], 1 }
 0x52b   :  { %525 = vsyncpa [#allocation12], 1 }
 0x52c   :  { %526 = vsyncpa [#allocation4], 1 }

</bundles_post_ra>
